<compile_context>
chip_gen: v5e
topology: v5e:2x2
jax: 0.10.0
libtpu: 0.0.40
codegen_flags: <defaults>
</compile_context>

<pallas_src>
import functools

import jax
import jax.numpy as jnp
import numpy as np
from jax.experimental import pallas as pl
from jax.experimental.pallas import tpu as pltpu

EPS = 1e-5          # nn.BatchNorm2d default eps
NEG_SLOPE = 0.01    # nn.LeakyReLU default negative_slope


def disc_block_kernel(x_ref, w_ref, mask_ref, gamma_ref, beta_ref, o_ref,
                      sum_ref, ssq_ref, shift0_ref, scale_ref, shift_ref,
                      *cache_refs,
                      kh, kw, W, SO_pad, Nb, count, count0, cache_y):
    phase = pl.program_id(0)             # 0: conv + statistics pass, 1: BN+act epilogue
    n = pl.program_id(1)                 # image-tile index (Nb images per tile)
    n_last = pl.num_programs(1) - 1
    cout = w_ref.shape[1]
    cin = w_ref.shape[2]
    y_cache_ref = cache_refs[0] if cache_y else None

    # ---- conv with fused im2col: kh*kw shifted in-VMEM views -> small MXU matmuls ----
    # y[b*Cout+co, ho*W+wo] = sum_{i,j,ci} w[i*kw+j, co, ci] * x_b[ci, (ho+i)*W + (wo+j)]
    def conv():
        ys = []
        for b in range(Nb):
            acc = jnp.zeros((cout, SO_pad), jnp.float32)
            for idx in range(kh * kw):
                i, j = divmod(idx, kw)
                seg = x_ref[pl.ds(b * cin, cin), pl.ds(i * W + j, SO_pad)]   # (Cin, SO_pad) bf16
                acc = acc + jnp.dot(w_ref[idx], seg,
                                    preferred_element_type=jnp.float32)
            ys.append(acc)
        return ys[0] if Nb == 1 else jnp.concatenate(ys, axis=0)            # (Nb*Cout, SO_pad)

    def fold_channels(v):   # (Nb*Cout, 1) -> (Cout, 1): sum the per-image slots
        out = v[0:cout]
        for b in range(1, Nb):
            out = out + v[b * cout:(b + 1) * cout]
        return out

    def tile_channels(v):   # (Cout, 1) -> (Nb*Cout, 1): replicate per image slot
        return v if Nb == 1 else jnp.concatenate([v] * Nb, axis=0)

    # ---- phase 0: conv tile -> y-cache + per-channel shifted-moment statistics ----
    @pl.when(phase == 0)
    def _stats():
        y = conv()
        if cache_y:
            y_cache_ref[n] = y           # persistent VMEM cache, consumed by phase 1
        m = mask_ref[...]                # 1.0 on real conv outputs, 0.0 on junk/pad cols

        @pl.when(n == 0)
        def _init():
            # Reference point for shifted-moments variance: first tile's channel means.
            s0 = fold_channels(jnp.sum(y * m, axis=1, keepdims=True))
            shift0_ref[...] = tile_channels(s0 * (1.0 / count0))
            sum_ref[...] = jnp.zeros_like(sum_ref)
            ssq_ref[...] = jnp.zeros_like(ssq_ref)

        c = (y - shift0_ref[...]) * m
        sum_ref[...] += jnp.sum(c, axis=1, keepdims=True)
        ssq_ref[...] += jnp.sum(c * c, axis=1, keepdims=True)

        @pl.when(n == n_last)
        def _finalize():
            inv = 1.0 / count
            s = fold_channels(sum_ref[...]) * inv          # E[y - shift0]
            q = fold_channels(ssq_ref[...]) * inv          # E[(y - shift0)^2]
            var = jnp.maximum(q - s * s, 0.0)              # biased (train-mode BN)
            mean = shift0_ref[...][0:cout] + s
            scale = gamma_ref[...] * jax.lax.rsqrt(var + EPS)
            scale_ref[...] = tile_channels(scale)
            shift_ref[...] = tile_channels(beta_ref[...] - mean * scale)

    # ---- phase 1: pure FMA + LeakyReLU epilogue on the cached conv output ----
    @pl.when(phase == 1)
    def _apply():
        y = y_cache_ref[n] if cache_y else conv()
        yn = y * scale_ref[...] + shift_ref[...]
        o_ref[...] = jnp.where(yn > 0, yn, NEG_SLOPE * yn)


def _pick_nb(N, Cout):
    """Images per grid step: largest Nb<=8 dividing N with Nb*Cout a multiple of 8
    (full f32 sublanes in the output block); else the largest divisor of N <= 8."""
    best_aligned, best_any = 0, 1
    for nb in range(1, min(N, 8) + 1):
        if N % nb:
            continue
        best_any = nb
        if (nb * Cout) % 8 == 0:
            best_aligned = nb
    return best_aligned or best_any


@jax.jit
def discriminator_block(x_nchw, conv_w, conv_b, bn_gamma, bn_beta):
    """x_nchw: (N, Cin, H, W); conv_w: (Cout, Cin, kh, kw); returns (N, Cout, Ho, Wo)."""
    del conv_b  # exactly cancelled by the train-mode BN batch-mean subtraction
    N, Cin, H, W = x_nchw.shape
    Cout, _, kh, kw = conv_w.shape
    Ho, Wo = H - kh + 1, W - kw + 1
    S = H * W
    SO = Ho * W                               # valid flattened output span (stride W rows)
    SO_pad = ((SO + 127) // 128) * 128        # lane-dense (multiple-of-128) output blocks
    S_pad = (kh - 1) * W + (kw - 1) + SO_pad  # every in-kernel slice [i*W+j : +SO_pad] in bounds

    Nb = _pick_nb(N, Cout)                    # images per grid step (Nb*Cout % 8 == 0 if possible)
    NT = N // Nb

    # NCHW -> (N, Cin, H*W) is a pure reshape (no transpose, no im2col copy); zero-pad the
    # flattened spatial axis and fold Nb images into the sublane axis of each block.
    x_k = jnp.pad(x_nchw.reshape(N, Cin, S), ((0, 0), (0, 0), (0, S_pad - S)))
    x_k = x_k.astype(jnp.bfloat16).reshape(NT, Nb * Cin, S_pad)

    # (Cout, Cin, kh, kw) -> (kh*kw, Cout, Cin): w_k[i*kw+j] is the (Cout, Cin) slice
    # for kernel offset (i, j).
    w_k = jnp.transpose(conv_w, (2, 3, 0, 1)).reshape(kh * kw, Cout, Cin).astype(jnp.bfloat16)

    gamma = bn_gamma.reshape(Cout, 1).astype(jnp.float32)
    beta = bn_beta.reshape(Cout, 1).astype(jnp.float32)

    # 1.0 where the flattened output column is a real conv output; 0.0 for the kw-1
    # wrap-around columns of each row and the 128-alignment pad tail (excluded from stats).
    cols = np.arange(SO_pad)
    mask = jnp.asarray(((cols % W < Wo) & (cols < SO)).astype(np.float32).reshape(1, SO_pad))

    count = N * Ho * Wo                 # BN normalization count (all images)
    count0 = Nb * Ho * Wo               # first tile's valid-element count (shift reference)

    # y-cache (NT, Nb*Cout, SO_pad) f32 lets phase 1 skip the conv recompute entirely;
    # keep it + double-buffered blocks comfortably inside v7x's 64 MiB VMEM.
    cache_bytes = NT * Nb * Cout * SO_pad * 4
    cache_y = cache_bytes <= 24 * 1024 * 1024
    # TODO(synk): when cache_y is False (huge N*H*W) phase 1 recomputes the conv; a
    # spatially tiled y-cache would remove that too.

    scratch = [pltpu.VMEM((Nb * Cout, 1), jnp.float32) for _ in range(5)]  # sum, ssq, shift0, scale, shift
    if cache_y:
        scratch.append(pltpu.VMEM((NT, Nb * Cout, SO_pad), jnp.float32))   # conv-output cache

    blk_bytes = 2 * (Nb * Cin * S_pad * 2 + Nb * Cout * SO_pad * 4)        # double-buffered in/out
    vmem_limit = int(min(96 * 2**20,
                         max(32 * 2**20,
                             2 * blk_bytes + (cache_bytes if cache_y else 0) + 2 * 2**20)))

    flops = (1 if cache_y else 2) * 2 * N * kh * kw * Cout * Cin * SO_pad
    bytes_accessed = ((1 if cache_y else 2) * x_k.size * 2 + w_k.size * 2
                      + (mask.size + gamma.size + beta.size) * 4
                      + NT * Nb * Cout * SO_pad * 4)

    kernel = functools.partial(disc_block_kernel, kh=kh, kw=kw, W=W, SO_pad=SO_pad,
                               Nb=Nb, count=count, count0=count0, cache_y=cache_y)

    out = pl.pallas_call(
        kernel,
        out_shape=jax.ShapeDtypeStruct((NT, Nb * Cout, SO_pad), jnp.float32),
        grid=(2, NT),                                      # (phase, image tile)
        in_specs=[
            # Phase 0 streams tiles 0..NT-1; phase 1 pins the block index at NT-1 (the block
            # already resident from the last phase-0 step) so x is never re-fetched.
            pl.BlockSpec((None, Nb * Cin, S_pad),
                         lambda p, n: (n * (1 - p) + (NT - 1) * p, 0, 0)),
            pl.BlockSpec((kh * kw, Cout, Cin), lambda p, n: (0, 0, 0)),    # weights (resident)
            pl.BlockSpec((1, SO_pad), lambda p, n: (0, 0)),                # valid-column mask
            pl.BlockSpec((Cout, 1), lambda p, n: (0, 0)),                  # gamma
            pl.BlockSpec((Cout, 1), lambda p, n: (0, 0)),                  # beta
        ],
        # Phase 0 never writes the output; park its index on block 0 so no spurious HBM
        # write-backs happen until phase 1 streams blocks 0..NT-1.  Relies on sequential
        # grid order -> both axes must stay "arbitrary".
        out_specs=pl.BlockSpec((None, Nb * Cout, SO_pad), lambda p, n: (p * n, 0, 0)),
        scratch_shapes=scratch,
        compiler_params=pltpu.CompilerParams(
            dimension_semantics=("arbitrary", "arbitrary"),
            vmem_limit_bytes=vmem_limit),
        cost_estimate=pl.CostEstimate(flops=int(flops), transcendentals=int(Cout),
                                      bytes_accessed=int(bytes_accessed)),
    )(x_k, w_k, mask, gamma, beta)

    # (NT, Nb*Cout, SO_pad) -> (N, Cout, SO_pad) -> drop pad tail -> (N, Cout, Ho, W)
    # -> drop the kw-1 wrap-around columns -> NCHW output.
    out = out.reshape(N, Cout, SO_pad)[:, :, :SO].reshape(N, Cout, Ho, W)[:, :, :, :Wo]
    return out


def _reference(x_nchw, conv_w, conv_b, bn_gamma, bn_beta):
    """Pure-JAX reference with the kernel's operand precision (bf16 conv operands,
    f32 accumulation / BN / activation), matching PyTorch forward semantics."""
    y = jax.lax.conv_general_dilated(
        x_nchw.astype(jnp.bfloat16), conv_w.astype(jnp.bfloat16),
        window_strides=(1, 1), padding="VALID",
        dimension_numbers=("NCHW", "OIHW", "NCHW"),
        preferred_element_type=jnp.float32)
    y = y + conv_b.reshape(1, -1, 1, 1)   # kept here to show it cancels under train-mode BN
    mean = jnp.mean(y, axis=(0, 2, 3), keepdims=True)
    var = jnp.mean((y - mean) ** 2, axis=(0, 2, 3), keepdims=True)
    y = (y - mean) * jax.lax.rsqrt(var + EPS)
    y = y * bn_gamma.reshape(1, -1, 1, 1) + bn_beta.reshape(1, -1, 1, 1)
    return jnp.where(y > 0, y, NEG_SLOPE * y)


if __name__ == "__main__":
    # Module hyper-params and a small NCHW input consistent with the module.
    kernel_size = 3
    channels = 4
    N, H, W = 2, 16, 16

    key = jax.random.PRNGKey(0)
    k_x, k_w, k_b = jax.random.split(key, 3)

    x = jax.random.normal(k_x, (N, channels, H, W), dtype=jnp.float32)

    fan_in = channels * kernel_size * kernel_size
    bound = 1.0 / float(np.sqrt(fan_in))
    conv_w = jax.random.uniform(k_w, (channels, channels, kernel_size, kernel_size),
                                minval=-bound, maxval=bound, dtype=jnp.float32)
    conv_b = jax.random.uniform(k_b, (channels,), minval=-bound, maxval=bound,
                                dtype=jnp.float32)
    bn_gamma = jnp.ones((channels,), dtype=jnp.float32)   # PyTorch default init
    bn_beta = jnp.zeros((channels,), dtype=jnp.float32)

    out = jax.block_until_ready(discriminator_block(x, conv_w, conv_b, bn_gamma, bn_beta))
    ref = jax.block_until_ready(_reference(x, conv_w, conv_b, bn_gamma, bn_beta))

    assert out.shape == (N, channels, H - kernel_size + 1, W - kernel_size + 1)
    max_err = float(jnp.max(jnp.abs(out - ref)))
    assert jnp.allclose(out, ref, atol=1e-3, rtol=1e-3), f"max abs err = {max_err}"

    print("KERNEL_OK")
</pallas_src>

<mosaic_0001>
module attributes {stable_mosaic.version = 11 : i64} {
  func.func @disc_block_kernel(%arg0: i32, %arg1: i32, %arg2: memref<1x8x290xbf16, #tpu.memory_space<vmem>>, %arg3: memref<9x4x4xbf16, #tpu.memory_space<vmem>>, %arg4: memref<1x256xf32, #tpu.memory_space<vmem>>, %arg5: memref<4x1xf32, #tpu.memory_space<vmem>>, %arg6: memref<4x1xf32, #tpu.memory_space<vmem>>, %arg7: memref<1x8x256xf32, #tpu.memory_space<vmem>>, %arg8: memref<8x1xf32, #tpu.memory_space<vmem>>, %arg9: memref<8x1xf32, #tpu.memory_space<vmem>>, %arg10: memref<8x1xf32, #tpu.memory_space<vmem>>, %arg11: memref<8x1xf32, #tpu.memory_space<vmem>>, %arg12: memref<8x1xf32, #tpu.memory_space<vmem>>, %arg13: memref<1x8x256xf32, #tpu.memory_space<vmem>>) attributes {dimension_semantics = [#tpu.dimension_semantics<arbitrary>, #tpu.dimension_semantics<arbitrary>], iteration_bounds = array<i64: 2, 1>, scalar_prefetch = 0 : i64, scratch_operands = 6 : i64, tpu.core_type = #tpu.core_type<tc>, window_params = [{transform_indices = @transform_0, window_bounds = array<i64: 1, 8, 290>}, {pipeline_mode = #tpu.pipeline_mode<synchronous>, transform_indices = @transform_1, window_bounds = array<i64: 9, 4, 4>}, {pipeline_mode = #tpu.pipeline_mode<synchronous>, transform_indices = @transform_2, window_bounds = array<i64: 1, 256>}, {pipeline_mode = #tpu.pipeline_mode<synchronous>, transform_indices = @transform_3, window_bounds = array<i64: 4, 1>}, {pipeline_mode = #tpu.pipeline_mode<synchronous>, transform_indices = @transform_4, window_bounds = array<i64: 4, 1>}, {transform_indices = @transform_5, window_bounds = array<i64: 1, 8, 256>}]} {
    %c0_i32 = arith.constant 0 : i32
    %0 = arith.cmpi eq, %arg0, %c0_i32 : i32
    %1 = arith.extui %0 : i1 to i32
    %c0_i32_0 = arith.constant 0 : i32
    %2 = arith.cmpi ne, %1, %c0_i32_0 : i32
    scf.if %2 {
      %cst = arith.constant 0.000000e+00 : f32
      %6 = vector.broadcast %cst : f32 to vector<4x256xf32>
      %c0 = arith.constant 0 : index
      %c0_2 = arith.constant 0 : index
      %c0_3 = arith.constant 0 : index
      %7 = vector.load %arg2[%c0, %c0_2, %c0_3] : memref<1x8x290xbf16, #tpu.memory_space<vmem>>, vector<1x4x256xbf16>
      %8 = vector.shape_cast %7 : vector<1x4x256xbf16> to vector<4x256xbf16>
      %c0_4 = arith.constant 0 : index
      %c0_5 = arith.constant 0 : index
      %c0_6 = arith.constant 0 : index
      %9 = vector.load %arg3[%c0_4, %c0_5, %c0_6] : memref<9x4x4xbf16, #tpu.memory_space<vmem>>, vector<1x4x4xbf16>
      %10 = vector.shape_cast %9 : vector<1x4x4xbf16> to vector<4x4xbf16>
      %cst_7 = arith.constant dense<0.000000e+00> : vector<4x256xf32>
      %11 = tpu.matmul %10, %8, %cst_7 {dimension_numbers = #tpu.dot_dimension_numbers<[1], [0], [0], [1], [0, 0, 1, 1], [], []>} : vector<4x4xbf16>, vector<4x256xbf16>, vector<4x256xf32> -> vector<4x256xf32>
      %12 = arith.addf %6, %11 : vector<4x256xf32>
      %c0_8 = arith.constant 0 : index
      %c0_9 = arith.constant 0 : index
      %c1 = arith.constant 1 : index
      %13 = vector.load %arg2[%c0_8, %c0_9, %c1] : memref<1x8x290xbf16, #tpu.memory_space<vmem>>, vector<1x4x256xbf16>
      %14 = vector.shape_cast %13 : vector<1x4x256xbf16> to vector<4x256xbf16>
      %c1_10 = arith.constant 1 : index
      %c0_11 = arith.constant 0 : index
      %c0_12 = arith.constant 0 : index
      %15 = vector.load %arg3[%c1_10, %c0_11, %c0_12] : memref<9x4x4xbf16, #tpu.memory_space<vmem>>, vector<1x4x4xbf16>
      %16 = vector.shape_cast %15 : vector<1x4x4xbf16> to vector<4x4xbf16>
      %cst_13 = arith.constant dense<0.000000e+00> : vector<4x256xf32>
      %17 = tpu.matmul %16, %14, %cst_13 {dimension_numbers = #tpu.dot_dimension_numbers<[1], [0], [0], [1], [0, 0, 1, 1], [], []>} : vector<4x4xbf16>, vector<4x256xbf16>, vector<4x256xf32> -> vector<4x256xf32>
      %18 = arith.addf %12, %17 : vector<4x256xf32>
      %c0_14 = arith.constant 0 : index
      %c0_15 = arith.constant 0 : index
      %c2 = arith.constant 2 : index
      %19 = vector.load %arg2[%c0_14, %c0_15, %c2] : memref<1x8x290xbf16, #tpu.memory_space<vmem>>, vector<1x4x256xbf16>
      %20 = vector.shape_cast %19 : vector<1x4x256xbf16> to vector<4x256xbf16>
      %c2_16 = arith.constant 2 : index
      %c0_17 = arith.constant 0 : index
      %c0_18 = arith.constant 0 : index
      %21 = vector.load %arg3[%c2_16, %c0_17, %c0_18] : memref<9x4x4xbf16, #tpu.memory_space<vmem>>, vector<1x4x4xbf16>
      %22 = vector.shape_cast %21 : vector<1x4x4xbf16> to vector<4x4xbf16>
      %cst_19 = arith.constant dense<0.000000e+00> : vector<4x256xf32>
      %23 = tpu.matmul %22, %20, %cst_19 {dimension_numbers = #tpu.dot_dimension_numbers<[1], [0], [0], [1], [0, 0, 1, 1], [], []>} : vector<4x4xbf16>, vector<4x256xbf16>, vector<4x256xf32> -> vector<4x256xf32>
      %24 = arith.addf %18, %23 : vector<4x256xf32>
      %c0_20 = arith.constant 0 : index
      %c0_21 = arith.constant 0 : index
      %c16 = arith.constant 16 : index
      %25 = vector.load %arg2[%c0_20, %c0_21, %c16] : memref<1x8x290xbf16, #tpu.memory_space<vmem>>, vector<1x4x256xbf16>
      %26 = vector.shape_cast %25 : vector<1x4x256xbf16> to vector<4x256xbf16>
      %c3 = arith.constant 3 : index
      %c0_22 = arith.constant 0 : index
      %c0_23 = arith.constant 0 : index
      %27 = vector.load %arg3[%c3, %c0_22, %c0_23] : memref<9x4x4xbf16, #tpu.memory_space<vmem>>, vector<1x4x4xbf16>
      %28 = vector.shape_cast %27 : vector<1x4x4xbf16> to vector<4x4xbf16>
      %cst_24 = arith.constant dense<0.000000e+00> : vector<4x256xf32>
      %29 = tpu.matmul %28, %26, %cst_24 {dimension_numbers = #tpu.dot_dimension_numbers<[1], [0], [0], [1], [0, 0, 1, 1], [], []>} : vector<4x4xbf16>, vector<4x256xbf16>, vector<4x256xf32> -> vector<4x256xf32>
      %30 = arith.addf %24, %29 : vector<4x256xf32>
      %c0_25 = arith.constant 0 : index
      %c0_26 = arith.constant 0 : index
      %c17 = arith.constant 17 : index
      %31 = vector.load %arg2[%c0_25, %c0_26, %c17] : memref<1x8x290xbf16, #tpu.memory_space<vmem>>, vector<1x4x256xbf16>
      %32 = vector.shape_cast %31 : vector<1x4x256xbf16> to vector<4x256xbf16>
      %c4 = arith.constant 4 : index
      %c0_27 = arith.constant 0 : index
      %c0_28 = arith.constant 0 : index
      %33 = vector.load %arg3[%c4, %c0_27, %c0_28] : memref<9x4x4xbf16, #tpu.memory_space<vmem>>, vector<1x4x4xbf16>
      %34 = vector.shape_cast %33 : vector<1x4x4xbf16> to vector<4x4xbf16>
      %cst_29 = arith.constant dense<0.000000e+00> : vector<4x256xf32>
      %35 = tpu.matmul %34, %32, %cst_29 {dimension_numbers = #tpu.dot_dimension_numbers<[1], [0], [0], [1], [0, 0, 1, 1], [], []>} : vector<4x4xbf16>, vector<4x256xbf16>, vector<4x256xf32> -> vector<4x256xf32>
      %36 = arith.addf %30, %35 : vector<4x256xf32>
      %c0_30 = arith.constant 0 : index
      %c0_31 = arith.constant 0 : index
      %c18 = arith.constant 18 : index
      %37 = vector.load %arg2[%c0_30, %c0_31, %c18] : memref<1x8x290xbf16, #tpu.memory_space<vmem>>, vector<1x4x256xbf16>
      %38 = vector.shape_cast %37 : vector<1x4x256xbf16> to vector<4x256xbf16>
      %c5 = arith.constant 5 : index
      %c0_32 = arith.constant 0 : index
      %c0_33 = arith.constant 0 : index
      %39 = vector.load %arg3[%c5, %c0_32, %c0_33] : memref<9x4x4xbf16, #tpu.memory_space<vmem>>, vector<1x4x4xbf16>
      %40 = vector.shape_cast %39 : vector<1x4x4xbf16> to vector<4x4xbf16>
      %cst_34 = arith.constant dense<0.000000e+00> : vector<4x256xf32>
      %41 = tpu.matmul %40, %38, %cst_34 {dimension_numbers = #tpu.dot_dimension_numbers<[1], [0], [0], [1], [0, 0, 1, 1], [], []>} : vector<4x4xbf16>, vector<4x256xbf16>, vector<4x256xf32> -> vector<4x256xf32>
      %42 = arith.addf %36, %41 : vector<4x256xf32>
      %c0_35 = arith.constant 0 : index
      %c0_36 = arith.constant 0 : index
      %c32 = arith.constant 32 : index
      %43 = vector.load %arg2[%c0_35, %c0_36, %c32] : memref<1x8x290xbf16, #tpu.memory_space<vmem>>, vector<1x4x256xbf16>
      %44 = vector.shape_cast %43 : vector<1x4x256xbf16> to vector<4x256xbf16>
      %c6 = arith.constant 6 : index
      %c0_37 = arith.constant 0 : index
      %c0_38 = arith.constant 0 : index
      %45 = vector.load %arg3[%c6, %c0_37, %c0_38] : memref<9x4x4xbf16, #tpu.memory_space<vmem>>, vector<1x4x4xbf16>
      %46 = vector.shape_cast %45 : vector<1x4x4xbf16> to vector<4x4xbf16>
      %cst_39 = arith.constant dense<0.000000e+00> : vector<4x256xf32>
      %47 = tpu.matmul %46, %44, %cst_39 {dimension_numbers = #tpu.dot_dimension_numbers<[1], [0], [0], [1], [0, 0, 1, 1], [], []>} : vector<4x4xbf16>, vector<4x256xbf16>, vector<4x256xf32> -> vector<4x256xf32>
      %48 = arith.addf %42, %47 : vector<4x256xf32>
      %c0_40 = arith.constant 0 : index
      %c0_41 = arith.constant 0 : index
      %c33 = arith.constant 33 : index
      %49 = vector.load %arg2[%c0_40, %c0_41, %c33] : memref<1x8x290xbf16, #tpu.memory_space<vmem>>, vector<1x4x256xbf16>
      %50 = vector.shape_cast %49 : vector<1x4x256xbf16> to vector<4x256xbf16>
      %c7 = arith.constant 7 : index
      %c0_42 = arith.constant 0 : index
      %c0_43 = arith.constant 0 : index
      %51 = vector.load %arg3[%c7, %c0_42, %c0_43] : memref<9x4x4xbf16, #tpu.memory_space<vmem>>, vector<1x4x4xbf16>
      %52 = vector.shape_cast %51 : vector<1x4x4xbf16> to vector<4x4xbf16>
      %cst_44 = arith.constant dense<0.000000e+00> : vector<4x256xf32>
      %53 = tpu.matmul %52, %50, %cst_44 {dimension_numbers = #tpu.dot_dimension_numbers<[1], [0], [0], [1], [0, 0, 1, 1], [], []>} : vector<4x4xbf16>, vector<4x256xbf16>, vector<4x256xf32> -> vector<4x256xf32>
      %54 = arith.addf %48, %53 : vector<4x256xf32>
      %c0_45 = arith.constant 0 : index
      %c0_46 = arith.constant 0 : index
      %c34 = arith.constant 34 : index
      %55 = vector.load %arg2[%c0_45, %c0_46, %c34] : memref<1x8x290xbf16, #tpu.memory_space<vmem>>, vector<1x4x256xbf16>
      %56 = vector.shape_cast %55 : vector<1x4x256xbf16> to vector<4x256xbf16>
      %c8 = arith.constant 8 : index
      %c0_47 = arith.constant 0 : index
      %c0_48 = arith.constant 0 : index
      %57 = vector.load %arg3[%c8, %c0_47, %c0_48] : memref<9x4x4xbf16, #tpu.memory_space<vmem>>, vector<1x4x4xbf16>
      %58 = vector.shape_cast %57 : vector<1x4x4xbf16> to vector<4x4xbf16>
      %cst_49 = arith.constant dense<0.000000e+00> : vector<4x256xf32>
      %59 = tpu.matmul %58, %56, %cst_49 {dimension_numbers = #tpu.dot_dimension_numbers<[1], [0], [0], [1], [0, 0, 1, 1], [], []>} : vector<4x4xbf16>, vector<4x256xbf16>, vector<4x256xf32> -> vector<4x256xf32>
      %60 = arith.addf %54, %59 : vector<4x256xf32>
      %cst_50 = arith.constant 0.000000e+00 : f32
      %61 = vector.broadcast %cst_50 : f32 to vector<4x256xf32>
      %c0_51 = arith.constant 0 : index
      %c4_52 = arith.constant 4 : index
      %c0_53 = arith.constant 0 : index
      %62 = vector.load %arg2[%c0_51, %c4_52, %c0_53] : memref<1x8x290xbf16, #tpu.memory_space<vmem>>, vector<1x4x256xbf16>
      %63 = vector.shape_cast %62 : vector<1x4x256xbf16> to vector<4x256xbf16>
      %c0_54 = arith.constant 0 : index
      %c0_55 = arith.constant 0 : index
      %c0_56 = arith.constant 0 : index
      %64 = vector.load %arg3[%c0_54, %c0_55, %c0_56] : memref<9x4x4xbf16, #tpu.memory_space<vmem>>, vector<1x4x4xbf16>
      %65 = vector.shape_cast %64 : vector<1x4x4xbf16> to vector<4x4xbf16>
      %cst_57 = arith.constant dense<0.000000e+00> : vector<4x256xf32>
      %66 = tpu.matmul %65, %63, %cst_57 {dimension_numbers = #tpu.dot_dimension_numbers<[1], [0], [0], [1], [0, 0, 1, 1], [], []>} : vector<4x4xbf16>, vector<4x256xbf16>, vector<4x256xf32> -> vector<4x256xf32>
      %67 = arith.addf %61, %66 : vector<4x256xf32>
      %c0_58 = arith.constant 0 : index
      %c4_59 = arith.constant 4 : index
      %c1_60 = arith.constant 1 : index
      %68 = vector.load %arg2[%c0_58, %c4_59, %c1_60] : memref<1x8x290xbf16, #tpu.memory_space<vmem>>, vector<1x4x256xbf16>
      %69 = vector.shape_cast %68 : vector<1x4x256xbf16> to vector<4x256xbf16>
      %c1_61 = arith.constant 1 : index
      %c0_62 = arith.constant 0 : index
      %c0_63 = arith.constant 0 : index
      %70 = vector.load %arg3[%c1_61, %c0_62, %c0_63] : memref<9x4x4xbf16, #tpu.memory_space<vmem>>, vector<1x4x4xbf16>
      %71 = vector.shape_cast %70 : vector<1x4x4xbf16> to vector<4x4xbf16>
      %cst_64 = arith.constant dense<0.000000e+00> : vector<4x256xf32>
      %72 = tpu.matmul %71, %69, %cst_64 {dimension_numbers = #tpu.dot_dimension_numbers<[1], [0], [0], [1], [0, 0, 1, 1], [], []>} : vector<4x4xbf16>, vector<4x256xbf16>, vector<4x256xf32> -> vector<4x256xf32>
      %73 = arith.addf %67, %72 : vector<4x256xf32>
      %c0_65 = arith.constant 0 : index
      %c4_66 = arith.constant 4 : index
      %c2_67 = arith.constant 2 : index
      %74 = vector.load %arg2[%c0_65, %c4_66, %c2_67] : memref<1x8x290xbf16, #tpu.memory_space<vmem>>, vector<1x4x256xbf16>
      %75 = vector.shape_cast %74 : vector<1x4x256xbf16> to vector<4x256xbf16>
      %c2_68 = arith.constant 2 : index
      %c0_69 = arith.constant 0 : index
      %c0_70 = arith.constant 0 : index
      %76 = vector.load %arg3[%c2_68, %c0_69, %c0_70] : memref<9x4x4xbf16, #tpu.memory_space<vmem>>, vector<1x4x4xbf16>
      %77 = vector.shape_cast %76 : vector<1x4x4xbf16> to vector<4x4xbf16>
      %cst_71 = arith.constant dense<0.000000e+00> : vector<4x256xf32>
      %78 = tpu.matmul %77, %75, %cst_71 {dimension_numbers = #tpu.dot_dimension_numbers<[1], [0], [0], [1], [0, 0, 1, 1], [], []>} : vector<4x4xbf16>, vector<4x256xbf16>, vector<4x256xf32> -> vector<4x256xf32>
      %79 = arith.addf %73, %78 : vector<4x256xf32>
      %c0_72 = arith.constant 0 : index
      %c4_73 = arith.constant 4 : index
      %c16_74 = arith.constant 16 : index
      %80 = vector.load %arg2[%c0_72, %c4_73, %c16_74] : memref<1x8x290xbf16, #tpu.memory_space<vmem>>, vector<1x4x256xbf16>
      %81 = vector.shape_cast %80 : vector<1x4x256xbf16> to vector<4x256xbf16>
      %c3_75 = arith.constant 3 : index
      %c0_76 = arith.constant 0 : index
      %c0_77 = arith.constant 0 : index
      %82 = vector.load %arg3[%c3_75, %c0_76, %c0_77] : memref<9x4x4xbf16, #tpu.memory_space<vmem>>, vector<1x4x4xbf16>
      %83 = vector.shape_cast %82 : vector<1x4x4xbf16> to vector<4x4xbf16>
      %cst_78 = arith.constant dense<0.000000e+00> : vector<4x256xf32>
      %84 = tpu.matmul %83, %81, %cst_78 {dimension_numbers = #tpu.dot_dimension_numbers<[1], [0], [0], [1], [0, 0, 1, 1], [], []>} : vector<4x4xbf16>, vector<4x256xbf16>, vector<4x256xf32> -> vector<4x256xf32>
      %85 = arith.addf %79, %84 : vector<4x256xf32>
      %c0_79 = arith.constant 0 : index
      %c4_80 = arith.constant 4 : index
      %c17_81 = arith.constant 17 : index
      %86 = vector.load %arg2[%c0_79, %c4_80, %c17_81] : memref<1x8x290xbf16, #tpu.memory_space<vmem>>, vector<1x4x256xbf16>
      %87 = vector.shape_cast %86 : vector<1x4x256xbf16> to vector<4x256xbf16>
      %c4_82 = arith.constant 4 : index
      %c0_83 = arith.constant 0 : index
      %c0_84 = arith.constant 0 : index
      %88 = vector.load %arg3[%c4_82, %c0_83, %c0_84] : memref<9x4x4xbf16, #tpu.memory_space<vmem>>, vector<1x4x4xbf16>
      %89 = vector.shape_cast %88 : vector<1x4x4xbf16> to vector<4x4xbf16>
      %cst_85 = arith.constant dense<0.000000e+00> : vector<4x256xf32>
      %90 = tpu.matmul %89, %87, %cst_85 {dimension_numbers = #tpu.dot_dimension_numbers<[1], [0], [0], [1], [0, 0, 1, 1], [], []>} : vector<4x4xbf16>, vector<4x256xbf16>, vector<4x256xf32> -> vector<4x256xf32>
      %91 = arith.addf %85, %90 : vector<4x256xf32>
      %c0_86 = arith.constant 0 : index
      %c4_87 = arith.constant 4 : index
      %c18_88 = arith.constant 18 : index
      %92 = vector.load %arg2[%c0_86, %c4_87, %c18_88] : memref<1x8x290xbf16, #tpu.memory_space<vmem>>, vector<1x4x256xbf16>
      %93 = vector.shape_cast %92 : vector<1x4x256xbf16> to vector<4x256xbf16>
      %c5_89 = arith.constant 5 : index
      %c0_90 = arith.constant 0 : index
      %c0_91 = arith.constant 0 : index
      %94 = vector.load %arg3[%c5_89, %c0_90, %c0_91] : memref<9x4x4xbf16, #tpu.memory_space<vmem>>, vector<1x4x4xbf16>
      %95 = vector.shape_cast %94 : vector<1x4x4xbf16> to vector<4x4xbf16>
      %cst_92 = arith.constant dense<0.000000e+00> : vector<4x256xf32>
      %96 = tpu.matmul %95, %93, %cst_92 {dimension_numbers = #tpu.dot_dimension_numbers<[1], [0], [0], [1], [0, 0, 1, 1], [], []>} : vector<4x4xbf16>, vector<4x256xbf16>, vector<4x256xf32> -> vector<4x256xf32>
      %97 = arith.addf %91, %96 : vector<4x256xf32>
      %c0_93 = arith.constant 0 : index
      %c4_94 = arith.constant 4 : index
      %c32_95 = arith.constant 32 : index
      %98 = vector.load %arg2[%c0_93, %c4_94, %c32_95] : memref<1x8x290xbf16, #tpu.memory_space<vmem>>, vector<1x4x256xbf16>
      %99 = vector.shape_cast %98 : vector<1x4x256xbf16> to vector<4x256xbf16>
      %c6_96 = arith.constant 6 : index
      %c0_97 = arith.constant 0 : index
      %c0_98 = arith.constant 0 : index
      %100 = vector.load %arg3[%c6_96, %c0_97, %c0_98] : memref<9x4x4xbf16, #tpu.memory_space<vmem>>, vector<1x4x4xbf16>
      %101 = vector.shape_cast %100 : vector<1x4x4xbf16> to vector<4x4xbf16>
      %cst_99 = arith.constant dense<0.000000e+00> : vector<4x256xf32>
      %102 = tpu.matmul %101, %99, %cst_99 {dimension_numbers = #tpu.dot_dimension_numbers<[1], [0], [0], [1], [0, 0, 1, 1], [], []>} : vector<4x4xbf16>, vector<4x256xbf16>, vector<4x256xf32> -> vector<4x256xf32>
      %103 = arith.addf %97, %102 : vector<4x256xf32>
      %c0_100 = arith.constant 0 : index
      %c4_101 = arith.constant 4 : index
      %c33_102 = arith.constant 33 : index
      %104 = vector.load %arg2[%c0_100, %c4_101, %c33_102] : memref<1x8x290xbf16, #tpu.memory_space<vmem>>, vector<1x4x256xbf16>
      %105 = vector.shape_cast %104 : vector<1x4x256xbf16> to vector<4x256xbf16>
      %c7_103 = arith.constant 7 : index
      %c0_104 = arith.constant 0 : index
      %c0_105 = arith.constant 0 : index
      %106 = vector.load %arg3[%c7_103, %c0_104, %c0_105] : memref<9x4x4xbf16, #tpu.memory_space<vmem>>, vector<1x4x4xbf16>
      %107 = vector.shape_cast %106 : vector<1x4x4xbf16> to vector<4x4xbf16>
      %cst_106 = arith.constant dense<0.000000e+00> : vector<4x256xf32>
      %108 = tpu.matmul %107, %105, %cst_106 {dimension_numbers = #tpu.dot_dimension_numbers<[1], [0], [0], [1], [0, 0, 1, 1], [], []>} : vector<4x4xbf16>, vector<4x256xbf16>, vector<4x256xf32> -> vector<4x256xf32>
      %109 = arith.addf %103, %108 : vector<4x256xf32>
      %c0_107 = arith.constant 0 : index
      %c4_108 = arith.constant 4 : index
      %c34_109 = arith.constant 34 : index
      %110 = vector.load %arg2[%c0_107, %c4_108, %c34_109] : memref<1x8x290xbf16, #tpu.memory_space<vmem>>, vector<1x4x256xbf16>
      %111 = vector.shape_cast %110 : vector<1x4x256xbf16> to vector<4x256xbf16>
      %c8_110 = arith.constant 8 : index
      %c0_111 = arith.constant 0 : index
      %c0_112 = arith.constant 0 : index
      %112 = vector.load %arg3[%c8_110, %c0_111, %c0_112] : memref<9x4x4xbf16, #tpu.memory_space<vmem>>, vector<1x4x4xbf16>
      %113 = vector.shape_cast %112 : vector<1x4x4xbf16> to vector<4x4xbf16>
      %cst_113 = arith.constant dense<0.000000e+00> : vector<4x256xf32>
      %114 = tpu.matmul %113, %111, %cst_113 {dimension_numbers = #tpu.dot_dimension_numbers<[1], [0], [0], [1], [0, 0, 1, 1], [], []>} : vector<4x4xbf16>, vector<4x256xbf16>, vector<4x256xf32> -> vector<4x256xf32>
      %115 = arith.addf %109, %114 : vector<4x256xf32>
      %116 = tpu.concatenate %60, %115 in 0 : vector<4x256xf32>, vector<4x256xf32> -> vector<8x256xf32>
      %117 = arith.index_cast %arg1 : i32 to index
      %c0_114 = arith.constant 0 : index
      %c0_115 = arith.constant 0 : index
      %118 = vector.load %arg13[%117, %c0_114, %c0_115] : memref<1x8x256xf32, #tpu.memory_space<vmem>>, vector<1x8x256xf32>
      %119 = vector.shape_cast %118 : vector<1x8x256xf32> to vector<8x256xf32>
      %120 = vector.shape_cast %116 : vector<8x256xf32> to vector<1x8x256xf32>
      tpu.vector_store %arg13[%117, %c0_114, %c0_115], %120 {strides = array<i32>} : memref<1x8x256xf32, #tpu.memory_space<vmem>>, vector<1x8x256xf32>,
      %c0_116 = arith.constant 0 : index
      %c0_117 = arith.constant 0 : index
      %121 = vector.load %arg4[%c0_116, %c0_117] : memref<1x256xf32, #tpu.memory_space<vmem>>, vector<1x256xf32>
      %c0_i32_118 = arith.constant 0 : i32
      %122 = arith.cmpi eq, %arg1, %c0_i32_118 : i32
      %123 = arith.extui %122 : i1 to i32
      %c0_i32_119 = arith.constant 0 : i32
      %124 = arith.cmpi ne, %123, %c0_i32_119 : i32
      scf.if %124 {
        %144 = vector.broadcast %121 : vector<1x256xf32> to vector<8x256xf32>
        %145 = arith.mulf %116, %144 : vector<8x256xf32>
        %cst_134 = arith.constant dense<0.000000e+00> : vector<8xf32>
        %146 = vector.multi_reduction <add>, %145, %cst_134 [1] : vector<8x256xf32> to vector<8xf32>
        %147 = vector.shape_cast %146 : vector<8xf32> to vector<8x1xf32>
        %148 = vector.extract_strided_slice %147 {offsets = [0, 0], sizes = [4, 1], strides = [1, 1]} : vector<8x1xf32> to vector<4x1xf32>
        %149 = vector.extract_strided_slice %147 {offsets = [4, 0], sizes = [4, 1], strides = [1, 1]} : vector<8x1xf32> to vector<4x1xf32>
        %150 = arith.addf %148, %149 : vector<4x1xf32>
        %cst_135 = arith.constant 0.00255102036 : f32
        %151 = vector.broadcast %cst_135 : f32 to vector<4x1xf32>
        %152 = arith.mulf %150, %151 : vector<4x1xf32>
        %153 = tpu.concatenate %152, %152 in 0 : vector<4x1xf32>, vector<4x1xf32> -> vector<8x1xf32>
        %c0_136 = arith.constant 0 : index
        %c0_137 = arith.constant 0 : index
        %154 = vector.load %arg10[%c0_136, %c0_137] : memref<8x1xf32, #tpu.memory_space<vmem>>, vector<8x1xf32>
        tpu.vector_store %arg10[%c0_136, %c0_137], %153 {strides = array<i32>} : memref<8x1xf32, #tpu.memory_space<vmem>>, vector<8x1xf32>,
        %cst_138 = arith.constant 0.000000e+00 : f32
        %155 = vector.broadcast %cst_138 : f32 to vector<8x1xf32>
        %c0_139 = arith.constant 0 : index
        %c0_140 = arith.constant 0 : index
        %156 = vector.load %arg8[%c0_139, %c0_140] : memref<8x1xf32, #tpu.memory_space<vmem>>, vector<8x1xf32>
        tpu.vector_store %arg8[%c0_139, %c0_140], %155 {strides = array<i32>} : memref<8x1xf32, #tpu.memory_space<vmem>>, vector<8x1xf32>,
        %cst_141 = arith.constant 0.000000e+00 : f32
        %157 = vector.broadcast %cst_141 : f32 to vector<8x1xf32>
        %c0_142 = arith.constant 0 : index
        %c0_143 = arith.constant 0 : index
        %158 = vector.load %arg9[%c0_142, %c0_143] : memref<8x1xf32, #tpu.memory_space<vmem>>, vector<8x1xf32>
        tpu.vector_store %arg9[%c0_142, %c0_143], %157 {strides = array<i32>} : memref<8x1xf32, #tpu.memory_space<vmem>>, vector<8x1xf32>,
      } else {
      }
      %c0_120 = arith.constant 0 : index
      %c0_121 = arith.constant 0 : index
      %125 = vector.load %arg10[%c0_120, %c0_121] : memref<8x1xf32, #tpu.memory_space<vmem>>, vector<8x1xf32>
      %126 = vector.broadcast %125 : vector<8x1xf32> to vector<8x256xf32>
      %127 = arith.subf %116, %126 : vector<8x256xf32>
      %128 = vector.broadcast %121 : vector<1x256xf32> to vector<8x256xf32>
      %129 = arith.mulf %127, %128 : vector<8x256xf32>
      %c0_122 = arith.constant 0 : index
      %c0_123 = arith.constant 0 : index
      %130 = vector.load %arg8[%c0_122, %c0_123] : memref<8x1xf32, #tpu.memory_space<vmem>>, vector<8x1xf32>
      %cst_124 = arith.constant dense<0.000000e+00> : vector<8xf32>
      %131 = vector.multi_reduction <add>, %129, %cst_124 [1] : vector<8x256xf32> to vector<8xf32>
      %132 = vector.shape_cast %131 : vector<8xf32> to vector<8x1xf32>
      %133 = arith.addf %130, %132 : vector<8x1xf32>
      %c0_125 = arith.constant 0 : index
      %c0_126 = arith.constant 0 : index
      %134 = vector.load %arg8[%c0_125, %c0_126] : memref<8x1xf32, #tpu.memory_space<vmem>>, vector<8x1xf32>
      tpu.vector_store %arg8[%c0_125, %c0_126], %133 {strides = array<i32>} : memref<8x1xf32, #tpu.memory_space<vmem>>, vector<8x1xf32>,
      %c0_127 = arith.constant 0 : index
      %c0_128 = arith.constant 0 : index
      %135 = vector.load %arg9[%c0_127, %c0_128] : memref<8x1xf32, #tpu.memory_space<vmem>>, vector<8x1xf32>
      %136 = arith.mulf %129, %129 : vector<8x256xf32>
      %cst_129 = arith.constant dense<0.000000e+00> : vector<8xf32>
      %137 = vector.multi_reduction <add>, %136, %cst_129 [1] : vector<8x256xf32> to vector<8xf32>
      %138 = vector.shape_cast %137 : vector<8xf32> to vector<8x1xf32>
      %139 = arith.addf %135, %138 : vector<8x1xf32>
      %c0_130 = arith.constant 0 : index
      %c0_131 = arith.constant 0 : index
      %140 = vector.load %arg9[%c0_130, %c0_131] : memref<8x1xf32, #tpu.memory_space<vmem>>, vector<8x1xf32>
      tpu.vector_store %arg9[%c0_130, %c0_131], %139 {strides = array<i32>} : memref<8x1xf32, #tpu.memory_space<vmem>>, vector<8x1xf32>,
      %c0_i32_132 = arith.constant 0 : i32
      %141 = arith.cmpi eq, %arg1, %c0_i32_132 : i32
      %142 = arith.extui %141 : i1 to i32
      %c0_i32_133 = arith.constant 0 : i32
      %143 = arith.cmpi ne, %142, %c0_i32_133 : i32
      scf.if %143 {
        %c0_134 = arith.constant 0 : index
        %c0_135 = arith.constant 0 : index
        %144 = vector.load %arg8[%c0_134, %c0_135] : memref<8x1xf32, #tpu.memory_space<vmem>>, vector<8x1xf32>
        %145 = vector.extract_strided_slice %144 {offsets = [0, 0], sizes = [4, 1], strides = [1, 1]} : vector<8x1xf32> to vector<4x1xf32>
        %146 = vector.extract_strided_slice %144 {offsets = [4, 0], sizes = [4, 1], strides = [1, 1]} : vector<8x1xf32> to vector<4x1xf32>
        %147 = arith.addf %145, %146 : vector<4x1xf32>
        %cst_136 = arith.constant 0.00255102036 : f32
        %148 = vector.broadcast %cst_136 : f32 to vector<4x1xf32>
        %149 = arith.mulf %147, %148 : vector<4x1xf32>
        %c0_137 = arith.constant 0 : index
        %c0_138 = arith.constant 0 : index
        %150 = vector.load %arg9[%c0_137, %c0_138] : memref<8x1xf32, #tpu.memory_space<vmem>>, vector<8x1xf32>
        %151 = vector.extract_strided_slice %150 {offsets = [0, 0], sizes = [4, 1], strides = [1, 1]} : vector<8x1xf32> to vector<4x1xf32>
        %152 = vector.extract_strided_slice %150 {offsets = [4, 0], sizes = [4, 1], strides = [1, 1]} : vector<8x1xf32> to vector<4x1xf32>
        %153 = arith.addf %151, %152 : vector<4x1xf32>
        %cst_139 = arith.constant 0.00255102036 : f32
        %154 = vector.broadcast %cst_139 : f32 to vector<4x1xf32>
        %155 = arith.mulf %153, %154 : vector<4x1xf32>
        %156 = arith.mulf %149, %149 : vector<4x1xf32>
        %157 = arith.subf %155, %156 : vector<4x1xf32>
        %cst_140 = arith.constant 0.000000e+00 : f32
        %158 = vector.broadcast %cst_140 : f32 to vector<4x1xf32>
        %159 = arith.maximumf %157, %158 : vector<4x1xf32>
        %c0_141 = arith.constant 0 : index
        %c0_142 = arith.constant 0 : index
        %160 = vector.load %arg10[%c0_141, %c0_142] : memref<8x1xf32, #tpu.memory_space<vmem>>, vector<8x1xf32>
        %161 = vector.extract_strided_slice %160 {offsets = [0, 0], sizes = [4, 1], strides = [1, 1]} : vector<8x1xf32> to vector<4x1xf32>
        %162 = arith.addf %161, %149 : vector<4x1xf32>
        %c0_143 = arith.constant 0 : index
        %c0_144 = arith.constant 0 : index
        %163 = vector.load %arg5[%c0_143, %c0_144] : memref<4x1xf32, #tpu.memory_space<vmem>>, vector<4x1xf32>
        %cst_145 = arith.constant 9.99999974E-6 : f32
        %164 = vector.broadcast %cst_145 : f32 to vector<4x1xf32>
        %165 = arith.addf %159, %164 : vector<4x1xf32>
        %166 = math.rsqrt %165 : vector<4x1xf32>
        %167 = arith.mulf %163, %166 : vector<4x1xf32>
        %168 = tpu.concatenate %167, %167 in 0 : vector<4x1xf32>, vector<4x1xf32> -> vector<8x1xf32>
        %c0_146 = arith.constant 0 : index
        %c0_147 = arith.constant 0 : index
        %169 = vector.load %arg11[%c0_146, %c0_147] : memref<8x1xf32, #tpu.memory_space<vmem>>, vector<8x1xf32>
        tpu.vector_store %arg11[%c0_146, %c0_147], %168 {strides = array<i32>} : memref<8x1xf32, #tpu.memory_space<vmem>>, vector<8x1xf32>,
        %c0_148 = arith.constant 0 : index
        %c0_149 = arith.constant 0 : index
        %170 = vector.load %arg6[%c0_148, %c0_149] : memref<4x1xf32, #tpu.memory_space<vmem>>, vector<4x1xf32>
        %171 = arith.mulf %162, %167 : vector<4x1xf32>
        %172 = arith.subf %170, %171 : vector<4x1xf32>
        %173 = tpu.concatenate %172, %172 in 0 : vector<4x1xf32>, vector<4x1xf32> -> vector<8x1xf32>
        %c0_150 = arith.constant 0 : index
        %c0_151 = arith.constant 0 : index
        %174 = vector.load %arg12[%c0_150, %c0_151] : memref<8x1xf32, #tpu.memory_space<vmem>>, vector<8x1xf32>
        tpu.vector_store %arg12[%c0_150, %c0_151], %173 {strides = array<i32>} : memref<8x1xf32, #tpu.memory_space<vmem>>, vector<8x1xf32>,
      } else {
      }
    } else {
    }
    %c1_i32 = arith.constant 1 : i32
    %3 = arith.cmpi eq, %arg0, %c1_i32 : i32
    %4 = arith.extui %3 : i1 to i32
    %c0_i32_1 = arith.constant 0 : i32
    %5 = arith.cmpi ne, %4, %c0_i32_1 : i32
    scf.if %5 {
      %6 = arith.index_cast %arg1 : i32 to index
      %c0 = arith.constant 0 : index
      %c0_2 = arith.constant 0 : index
      %7 = vector.load %arg13[%6, %c0, %c0_2] : memref<1x8x256xf32, #tpu.memory_space<vmem>>, vector<1x8x256xf32>
      %8 = vector.shape_cast %7 : vector<1x8x256xf32> to vector<8x256xf32>
      %c0_3 = arith.constant 0 : index
      %c0_4 = arith.constant 0 : index
      %9 = vector.load %arg11[%c0_3, %c0_4] : memref<8x1xf32, #tpu.memory_space<vmem>>, vector<8x1xf32>
      %10 = vector.broadcast %9 : vector<8x1xf32> to vector<8x256xf32>
      %11 = arith.mulf %8, %10 : vector<8x256xf32>
      %c0_5 = arith.constant 0 : index
      %c0_6 = arith.constant 0 : index
      %12 = vector.load %arg12[%c0_5, %c0_6] : memref<8x1xf32, #tpu.memory_space<vmem>>, vector<8x1xf32>
      %13 = vector.broadcast %12 : vector<8x1xf32> to vector<8x256xf32>
      %14 = arith.addf %11, %13 : vector<8x256xf32>
      %cst = arith.constant 0.000000e+00 : f32
      %15 = vector.broadcast %cst : f32 to vector<8x256xf32>
      %16 = arith.cmpf ogt, %14, %15 : vector<8x256xf32>
      %cst_7 = arith.constant 0.00999999977 : f32
      %17 = vector.broadcast %cst_7 : f32 to vector<8x256xf32>
      %18 = arith.mulf %17, %14 : vector<8x256xf32>
      %19 = arith.select %16, %14, %18 : vector<8x256xi1>, vector<8x256xf32>
      %c0_8 = arith.constant 0 : index
      %c0_9 = arith.constant 0 : index
      %c0_10 = arith.constant 0 : index
      %20 = vector.load %arg7[%c0_8, %c0_9, %c0_10] : memref<1x8x256xf32, #tpu.memory_space<vmem>>, vector<1x8x256xf32>
      %21 = vector.shape_cast %20 : vector<1x8x256xf32> to vector<8x256xf32>
      %22 = vector.shape_cast %19 : vector<8x256xf32> to vector<1x8x256xf32>
      tpu.vector_store %arg7[%c0_8, %c0_9, %c0_10], %22 {strides = array<i32>} : memref<1x8x256xf32, #tpu.memory_space<vmem>>, vector<1x8x256xf32>,
    } else {
    }
    return
  }
  func.func @transform_0(%arg0: i32, %arg1: i32) -> (i32, i32, i32) {
    %c1_i32 = arith.constant 1 : i32
    %0 = arith.subi %c1_i32, %arg0 : i32
    %1 = arith.muli %arg1, %0 : i32
    %c0_i32 = arith.constant 0 : i32
    %2 = arith.muli %c0_i32, %arg0 : i32
    %3 = arith.addi %1, %2 : i32
    %c0_i32_0 = arith.constant 0 : i32
    %c0_i32_1 = arith.constant 0 : i32
    %c0_i32_2 = arith.constant 0 : i32
    return %3, %c0_i32_0, %c0_i32_1 : i32, i32, i32
  }
  func.func @transform_1(%arg0: i32, %arg1: i32) -> (i32, i32, i32) {
    %c0_i32 = arith.constant 0 : i32
    %c0_i32_0 = arith.constant 0 : i32
    %c0_i32_1 = arith.constant 0 : i32
    %c0_i32_2 = arith.constant 0 : i32
    return %c0_i32, %c0_i32_0, %c0_i32_1 : i32, i32, i32
  }
  func.func @transform_2(%arg0: i32, %arg1: i32) -> (i32, i32) {
    %c0_i32 = arith.constant 0 : i32
    %c0_i32_0 = arith.constant 0 : i32
    %c0_i32_1 = arith.constant 0 : i32
    return %c0_i32, %c0_i32_0 : i32, i32
  }
  func.func @transform_3(%arg0: i32, %arg1: i32) -> (i32, i32) {
    %c0_i32 = arith.constant 0 : i32
    %c0_i32_0 = arith.constant 0 : i32
    %c0_i32_1 = arith.constant 0 : i32
    return %c0_i32, %c0_i32_0 : i32, i32
  }
  func.func @transform_4(%arg0: i32, %arg1: i32) -> (i32, i32) {
    %c0_i32 = arith.constant 0 : i32
    %c0_i32_0 = arith.constant 0 : i32
    %c0_i32_1 = arith.constant 0 : i32
    return %c0_i32, %c0_i32_0 : i32, i32
  }
  func.func @transform_5(%arg0: i32, %arg1: i32) -> (i32, i32, i32) {
    %0 = arith.muli %arg0, %arg1 : i32
    %c0_i32 = arith.constant 0 : i32
    %c0_i32_0 = arith.constant 0 : i32
    %c0_i32_1 = arith.constant 0 : i32
    return %0, %c0_i32, %c0_i32_0 : i32, i32, i32
  }
}

</mosaic_0001>

<bundles_post_ra>
// kernel: discriminator_block.1
= control target key start
LH: loop header
LB: loop body
LE: loop exit
PB: predicated region body
PF: predicated region fallthrough
CT: control target
= control target key end

     0   :  { %s1453_s18 = smov 0   ;;  %s1455_s19 = smov 0   ;;  %s1778_s0 = inlined_call_operand.vmem [shape: bf16[1,8,290], index: 0, kind: input, shape index: {}]   ;;  %s1779_s1 = inlined_call_operand.vmem [shape: bf16[9,4,4], index: 1, kind: input, shape index: {}]   ;;  %s1780_s2 = inlined_call_operand.vmem [shape: f32[1,256], index: 2, kind: input, shape index: {}]   ;;  %s1781_s3 = inlined_call_operand.vmem [shape: f32[4,1], index: 3, kind: input, shape index: {}]   ;;  %s1782_s4 = inlined_call_operand.vmem [shape: f32[4,1], index: 4, kind: input, shape index: {}]   ;;  %s1783_s5 = inlined_call_operand.vmem [shape: f32[1,8,256], index: 5, kind: output, shape index: {}]  }
   0x1   :  { %s1457_s20 = smov 0  }
   0x2 LB: > { %s27_s21 = sadd.s32 1, %s1406_s19  ;;  %p1297_p0 = scmp.ge.s32.totalorder %s1410_s20, 1  ;;  %s1410_s20 = sphi %s1457_s20, %s15_s20   ;;  %s1406_s19 = sphi %s1455_s19, %s1785_s19   ;;  %s1402_s18 = sphi %s1453_s18, %s1784_s18  }
   0x3   : > { %p29_p1 = scmp.ge.s32.totalorder %s27_s21, 2  ;;  %p209_p2 = scmp.lt.s32.totalorder %s1410_s20, 3 }
   0x5   : > { %s1787_s21 = smov (%p29_p1, %s27_s21), 0  ;;  %p210_p3 = pnand %p1297_p0, %p209_p2 }
   0x6   : > { %p1298_p4 = scmp.ne.s32.totalorder (!%p210_p3), %s1402_s18, 0 }
   0x7   : > { %213 = sbr.rel (%p210_p3) target bundleno = 976 (0x3d0), region = 40 }
   0xc   : > { %260 = sbr.rel (%p1298_p4) target bundleno = 837 (0x345), region = 44  ;;  %s1412_s26 = smov (!%p1298_p4), 127  }
   0xd   : > { %s1413_s27 = smov (!%p1298_p4), 112   ;;  %s1414_s28 = smov (!%p1298_p4), 126  }
   0xe   : > { %s1415_s29 = smov (!%p1298_p4), 110   ;;  %s1416_s30 = smov (!%p1298_p4), 111  }
   0xf   : > { %s1417_s6 = smov (!%p1298_p4), 95   ;;  %s1418_s11 = smov (!%p1298_p4), 96  }
  0x10   : > { %s1419_s12 = smov (!%p1298_p4), 94  }
  0x11   : > { %v263_v0 = vld [vmem:[%s1778_s0 + $0x8] sm:$0x3]  ;;  %v261_v1 = vld [vmem:[%s1778_s0] sm:$0x33]  ;;  %v691_v8 = vld [vmem:[%s1778_s0] sm:$0xcc] }
  0x12   : > { %v270_v2 = vunpack.c.l.b16 %v263_v0  ;;  %v268_v3 = vunpack.c.l.b16 %v261_v1  ;;  %v269_v4 = vunpack.c.h.b16 %v261_v1  ;;  %v692_v9 = vld [vmem:[%s1778_s0 + $0x8] sm:$0xc]  ;;  %v696_v10 = vunpack.c.h.b16 %v691_v8  ;;  %v1534_v21 = vld [vmem:[%s1779_s1] sm:$0x3]  ;;  %v1555_v26 = vld [vmem:[%s1779_s1 + $0x6] sm:$0x3] }
  0x13   : > { %v695_v11 = vunpack.c.l.b16 %v691_v8  ;;  %v697_v12 = vunpack.c.l.b16 %v692_v9  ;;  %vm287_vm0 = vcmask 1041408   ;;  %vm283_vm1 = vcmask 31744   ;;  %v1583_v39 = vld [vmem:[%s1779_s1 + $0x2] sm:$0x3]  ;;  %v1602_v54 = vld [vmem:[%s1779_s1 + $0x4] sm:$0x3] }
  0x14   : > { %v273_v5 = vpack.c.b16 %v270_v2, %v270_v2  ;;  %v271_v6 = vpack.c.b16 %v268_v3, %v268_v3  ;;  %v272_v7 = vpack.c.b16 %v269_v4, %v269_v4  ;;  %v699_v13 = vpack.c.b16 %v696_v10, %v696_v10  ;;  %v1607_v55 = vld [vmem:[%s1779_s1 + $0xa] sm:$0x3] }
  0x15   : > { %v698_v14 = vpack.c.b16 %v695_v11, %v695_v11  ;;  %v700_v15 = vpack.c.b16 %v697_v12, %v697_v12  ;;  %vm411_vm2 = vcmask 916480   ;;  %vm280_vm3 = vcmask 1039360  }
  0x16   : > { %278 = vrot.lane.b32.xlu1 %v273_v5, %s1412_s26  ;;  %274 = vrot.lane.b32.xlu0 %v271_v6, %s1412_s26  ;;  %v1507_v16 = vrot.slane %v699_v13, 2  ;;  %v327_v19 = vsel %vm287_vm0, %v272_v7, 0  ;;  %v324_v20 = vsel %vm287_vm0, %v271_v6, 0  ;;  %vm363_vm4 = vcmask 1031168  }
  0x17   : > { %407 = vrot.lane.b32.xlu2 %v272_v7, %s1413_s27  ;;  %v1509_v17 = vrot.slane %v698_v14, 2  ;;  %v703_v18 = vrot.slane %v700_v15, 2  ;;  %349 = vmatpush.bf16.msra.mxu3 %v327_v19  ;;  %vm507_vm5 = vcmask 900096   ;;  %vm459_vm6 = vcmask 908288  }
  0x18   : > { %336 = vmatpush.bf16.msra.mxu2 %v324_v20  ;;  %vm603_vm7 = vcmask 777216   ;;  %vm555_vm8 = vcmask 785408   ;;  %vm651_vm9 = vcmask 769024   ;;  %vm1076_vm10 = vcmask 1043456  }
  0x19   : > { %vm1108_vm11 = vcmask 7168  }
  0x1a   : > { %1303 = vmatmul.msk.bf16.vlgmr.msra.gmra.mxu3 %vm283_vm1, %v1534_v21 }
  0x1b   : > { %1302 = vmatmul.msk.bf16.vlgmr.msra.gmra.mxu2 %vm283_vm1, %v1534_v21 }
  0x1e   : > { %405 = vrot.lane.b32.xlu1 %v271_v6, %s1413_s27  ;;  %276 = vrot.lane.b32.xlu0 %v272_v7, %s1412_s26 }
  0x1f   : > { %409 = vrot.lane.b32.xlu2 %v273_v5, %s1413_s27 }
  0x26   : > { %359 = vrot.lane.b32.xlu1 %v272_v7, %s1414_s28  ;;  %357 = vrot.lane.b32.xlu0 %v271_v6, %s1414_s28 }
  0x27   : > { %361 = vrot.lane.b32.xlu2 %v273_v5, %s1414_s28 }
  0x2e   : > { %503 = vrot.lane.b32.xlu1 %v272_v7, %s1415_s29  ;;  %501 = vrot.lane.b32.xlu0 %v271_v6, %s1415_s29 }
  0x2f   : > { %505 = vrot.lane.b32.xlu2 %v273_v5, %s1415_s29 }
  0x36   : > { %455 = vrot.lane.b32.xlu1 %v272_v7, %s1416_s30  ;;  %453 = vrot.lane.b32.xlu0 %v271_v6, %s1416_s30 }
  0x37   : > { %457 = vrot.lane.b32.xlu2 %v273_v5, %s1416_s30 }
  0x3e   : > { %599 = vrot.lane.b32.xlu1 %v272_v7, %s1417_s6  ;;  %597 = vrot.lane.b32.xlu0 %v271_v6, %s1417_s6 }
  0x3f   : > { %601 = vrot.lane.b32.xlu2 %v273_v5, %s1417_s6 }
  0x46   : > { %551 = vrot.lane.b32.xlu1 %v272_v7, %s1418_s11  ;;  %549 = vrot.lane.b32.xlu0 %v271_v6, %s1418_s11 }
  0x47   : > { %553 = vrot.lane.b32.xlu2 %v273_v5, %s1418_s11 }
  0x4e   : > { %706 = vrot.lane.b32.xlu1 %v1507_v16, %s1412_s26  ;;  %704 = vrot.lane.b32.xlu0 %v1509_v17, %s1412_s26 }
  0x4f   : > { %708 = vrot.lane.b32.xlu2 %v703_v18, %s1412_s26 }
  0x56   : > { %647 = vrot.lane.b32.xlu1 %v272_v7, %s1419_s12  ;;  %645 = vrot.lane.b32.xlu0 %v271_v6, %s1419_s12  ;;  %v1628_v6 = vld [vmem:[%s1779_s1 + $0x8] sm:$0x3]  ;;  %v1633_v7 = vld [vmem:[%s1779_s1 + $0xe] sm:$0x3] }
  0x57   : > { %649 = vrot.lane.b32.xlu2 %v273_v5, %s1419_s12 }
  0x5e   : > { %778 = vrot.lane.b32.xlu1 %v1507_v16, %s1414_s28  ;;  %776 = vrot.lane.b32.xlu0 %v1509_v17, %s1414_s28 }
  0x5f   : > { %780 = vrot.lane.b32.xlu2 %v703_v18, %s1414_s28 }
  0x66   : > { %862 = vrot.lane.b32.xlu1 %v1507_v16, %s1416_s30  ;;  %860 = vrot.lane.b32.xlu0 %v1509_v17, %s1416_s30 }
  0x67   : > { %864 = vrot.lane.b32.xlu2 %v703_v18, %s1416_s30 }
  0x6e   : > { %820 = vrot.lane.b32.xlu1 %v1507_v16, %s1413_s27  ;;  %818 = vrot.lane.b32.xlu0 %v1509_v17, %s1413_s27 }
  0x6f   : > { %822 = vrot.lane.b32.xlu2 %v703_v18, %s1413_s27 }
  0x71   : > { %v408_v22 = vpop.permute.xlu2 %407 }
  0x76   : > { %946 = vrot.lane.b32.xlu1 %v1507_v16, %s1418_s11  ;;  %944 = vrot.lane.b32.xlu0 %v1509_v17, %s1418_s11 }
  0x77   : > { %948 = vrot.lane.b32.xlu2 %v703_v18, %s1418_s11 }
  0x79   : > { %v410_v23 = vpop.permute.xlu2 %409 }
  0x7a   : > { %v413_v24 = vsel %vm411_vm2, %v408_v22, %v410_v23 }
  0x7b   : > { %v421_v25 = vsel %vm287_vm0, %v413_v24, 0  ;;  %v1654_v24 = vld [vmem:[%s1779_s1 + $0xc] sm:$0x3] }
  0x7c   : > { %443 = vmatpush.bf16.msrb.mxu3 %v421_v25 }
  0x7e   : > { %904 = vrot.lane.b32.xlu1 %v1507_v16, %s1415_s29  ;;  %902 = vrot.lane.b32.xlu0 %v1509_v17, %s1415_s29 }
  0x7f   : > { %906 = vrot.lane.b32.xlu2 %v703_v18, %s1415_s29  ;;  %1309 = vmatmul.msk.bf16.vlgmr.msrb.gmra.mxu3 %vm283_vm1, %v1555_v26 }
  0x81   : > { %v362_v27 = vpop.permute.xlu2 %361 }
  0x86   : > { %1030 = vrot.lane.b32.xlu1 %v1507_v16, %s1419_s12  ;;  %1028 = vrot.lane.b32.xlu0 %v1509_v17, %s1419_s12 }
  0x87   : > { %1032 = vrot.lane.b32.xlu2 %v703_v18, %s1419_s12 }
  0x88   : > { %v279_v28 = vpop.permute.xlu1 %278  ;;  %v275_v29 = vpop.permute.xlu0 %274 }
  0x89   : > { %v506_v30 = vpop.permute.xlu2 %505 }
  0x8e   : > { %988 = vrot.lane.b32.xlu1 %v1507_v16, %s1417_s6  ;;  %986 = vrot.lane.b32.xlu0 %v1509_v17, %s1417_s6 }
  0x8f   : > { %990 = vrot.lane.b32.xlu2 %v703_v18, %s1417_s6 }
  0x90   : > { %v406_v31 = vpop.permute.xlu1 %405  ;;  %v277_v32 = vpop.permute.xlu0 %276 }
  0x91   : > { %v281_v33 = vsel %vm280_vm3, %v275_v29, %v277_v32  ;;  %v282_v34 = vsel %vm280_vm3, %v277_v32, %v279_v28  ;;  %v412_v35 = vsel %vm411_vm2, %v406_v31, %v408_v22  ;;  %v458_v40 = vpop.permute.xlu2 %457  ;;  %v745_v31 = vsel %vm287_vm0, %v1509_v17, 0 }
  0x92   : > { %v289_v36 = vsel %vm287_vm0, %v281_v33, 0  ;;  %v292_v37 = vsel %vm287_vm0, %v282_v34, 0  ;;  %v418_v38 = vsel %vm287_vm0, %v412_v35, 0  ;;  %v748_v32 = vsel %vm287_vm0, %v1507_v16, 0  ;;  %v1679_v16 = vld [vmem:[%s1779_s1 + $0x10] sm:$0x3] }
  0x93   : > { %301 = vmatpush.bf16.msra.mxu0 %v289_v36  ;;  %314 = vmatpush.bf16.msra.mxu1 %v292_v37 }
  0x94   : > { %430 = vmatpush.bf16.msrb.mxu2 %v418_v38 }
  0x96   : > { %1300 = vmatmul.msk.bf16.vlgmr.msra.gmra.mxu0 %vm283_vm1, %v1583_v39  ;;  %1301 = vmatmul.msk.bf16.vlgmr.msra.gmra.mxu1 %vm283_vm1, %v1583_v39 }
  0x97   : > { %1308 = vmatmul.msk.bf16.vlgmr.msrb.gmra.mxu2 %vm283_vm1, %v1555_v26 }
  0x98   : > { %v360_v41 = vpop.permute.xlu1 %359  ;;  %v358_v42 = vpop.permute.xlu0 %357 }
  0x99   : > { %v364_v43 = vsel %vm363_vm4, %v358_v42, %v360_v41  ;;  %v365_v44 = vsel %vm363_vm4, %v360_v41, %v362_v27  ;;  %v602_v47 = vpop.permute.xlu2 %601 }
  0x9a   : > { %v370_v45 = vsel %vm287_vm0, %v364_v43, 0  ;;  %v373_v46 = vsel %vm287_vm0, %v365_v44, 0 }
  0x9b   : > { %382 = vmatpush.bf16.msrb.mxu0 %v370_v45  ;;  %395 = vmatpush.bf16.msrb.mxu1 %v373_v46 }
  0xa0   : > { %v504_v48 = vpop.permute.xlu1 %503  ;;  %v502_v49 = vpop.permute.xlu0 %501 }
  0xa1   : > { %v509_v50 = vsel %vm507_vm5, %v504_v48, %v506_v30  ;;  %v508_v51 = vsel %vm507_vm5, %v502_v49, %v504_v48  ;;  %v554_v56 = vpop.permute.xlu2 %553 }
  0xa2   : > { %v517_v52 = vsel %vm287_vm0, %v509_v50, 0  ;;  %v514_v53 = vsel %vm287_vm0, %v508_v51, 0 }
  0xa3   : > { %526 = vmatpush.bf16.msra.mxu2 %v514_v53  ;;  %539 = vmatpush.bf16.msra.mxu3 %v517_v52 }
  0xa6   : > { %1305 = vmatmul.msk.bf16.vlgmr.msrb.gmra.mxu0 %vm283_vm1, %v1602_v54  ;;  %1306 = vmatmul.msk.bf16.vlgmr.msrb.gmra.mxu1 %vm283_vm1, %v1602_v54 }
  0xa7   : > { %1314 = vmatmul.msk.bf16.vlgmr.msra.gmra.mxu2 %vm283_vm1, %v1607_v55  ;;  %1315 = vmatmul.msk.bf16.vlgmr.msra.gmra.mxu3 %vm283_vm1, %v1607_v55 }
  0xa8   : > { %v456_v57 = vpop.permute.xlu1 %455  ;;  %v454_v58 = vpop.permute.xlu0 %453 }
  0xa9   : > { %v461_v59 = vsel %vm459_vm6, %v456_v57, %v458_v40  ;;  %v460_v60 = vsel %vm459_vm6, %v454_v58, %v456_v57  ;;  %v709_v3 = vpop.permute.xlu2 %708 }
  0xaa   : > { %v469_v61 = vsel %vm287_vm0, %v461_v59, 0  ;;  %v466_v62 = vsel %vm287_vm0, %v460_v60, 0 }
  0xab   : > { %478 = vmatpush.bf16.msra.mxu0 %v466_v62  ;;  %491 = vmatpush.bf16.msra.mxu1 %v469_v61 }
  0xb0   : > { %v600_v63 = vpop.permute.xlu1 %599  ;;  %v598_v0 = vpop.permute.xlu0 %597 }
  0xb1   : > { %v605_v1 = vsel %vm603_vm7, %v600_v63, %v602_v47  ;;  %v604_v2 = vsel %vm603_vm7, %v598_v0, %v600_v63  ;;  %v650_v14 = vpop.permute.xlu2 %649  ;;  %v338_v63 = vpop.f32.mrf.mxu2 }
  0xb2   : > { %v613_v4 = vsel %vm287_vm0, %v605_v1, 0  ;;  %v610_v5 = vsel %vm287_vm0, %v604_v2, 0 }
  0xb3   : > { %622 = vmatpush.bf16.msrb.mxu2 %v610_v5  ;;  %635 = vmatpush.bf16.msrb.mxu3 %v613_v4 }
  0xb6   : > { %1311 = vmatmul.msk.bf16.vlgmr.msra.gmra.mxu0 %vm283_vm1, %v1628_v6  ;;  %1312 = vmatmul.msk.bf16.vlgmr.msra.gmra.mxu1 %vm283_vm1, %v1628_v6 }
  0xb7   : > { %1320 = vmatmul.msk.bf16.vlgmr.msrb.gmra.mxu2 %vm283_vm1, %v1633_v7  ;;  %1321 = vmatmul.msk.bf16.vlgmr.msrb.gmra.mxu3 %vm283_vm1, %v1633_v7 }
  0xb8   : > { %v552_v8 = vpop.permute.xlu1 %551  ;;  %v550_v9 = vpop.permute.xlu0 %549 }
  0xb9   : > { %v557_v10 = vsel %vm555_vm8, %v552_v8, %v554_v56  ;;  %v556_v11 = vsel %vm555_vm8, %v550_v9, %v552_v8  ;;  %v781_v25 = vpop.permute.xlu2 %780  ;;  %v340_v9 = vpop.f32.mrf.mxu2 }
  0xba   : > { %v565_v12 = vsel %vm287_vm0, %v557_v10, 0  ;;  %v562_v13 = vsel %vm287_vm0, %v556_v11, 0 }
  0xbb   : > { %574 = vmatpush.bf16.msrb.mxu0 %v562_v13  ;;  %587 = vmatpush.bf16.msrb.mxu1 %v565_v12 }
  0xc0   : > { %v707_v15 = vpop.permute.xlu1 %706  ;;  %v705_v18 = vpop.permute.xlu0 %704 }
  0xc1   : > { %v711_v19 = vsel %vm280_vm3, %v707_v15, %v709_v3  ;;  %v710_v20 = vsel %vm280_vm3, %v705_v18, %v707_v15  ;;  %v865_v35 = vpop.permute.xlu2 %864 }
  0xc2   : > { %v716_v22 = vsel %vm287_vm0, %v711_v19, 0  ;;  %v713_v23 = vsel %vm287_vm0, %v710_v20, 0 }
  0xc3   : > { %725 = vmatpush.bf16.msra.mxu2 %v713_v23  ;;  %738 = vmatpush.bf16.msra.mxu3 %v716_v22 }
  0xc6   : > { %1317 = vmatmul.msk.bf16.vlgmr.msrb.gmra.mxu0 %vm283_vm1, %v1654_v24  ;;  %1318 = vmatmul.msk.bf16.vlgmr.msrb.gmra.mxu1 %vm283_vm1, %v1654_v24 }
  0xc7   : > { %1325 = vmatmul.msk.bf16.vlgmr.msra.gmra.mxu2 %vm283_vm1, %v1583_v39  ;;  %1326 = vmatmul.msk.bf16.vlgmr.msra.gmra.mxu3 %vm283_vm1, %v1583_v39 }
  0xc8   : > { %v648_v27 = vpop.permute.xlu1 %647  ;;  %v646_v28 = vpop.permute.xlu0 %645 }
  0xc9   : > { %v653_v29 = vsel %vm651_vm9, %v648_v27, %v650_v14  ;;  %v652_v30 = vsel %vm651_vm9, %v646_v28, %v648_v27  ;;  %v823_v41 = vpop.permute.xlu2 %822 }
  0xca   : > { %v661_v33 = vsel %vm287_vm0, %v653_v29, 0  ;;  %v658_v34 = vsel %vm287_vm0, %v652_v30, 0 }
  0xcb   : > { %670 = vmatpush.bf16.msra.mxu0 %v658_v34  ;;  %683 = vmatpush.bf16.msra.mxu1 %v661_v33 }
  0xcf   : > { %757 = vmatpush.bf16.msrb.mxu0 %v745_v31  ;;  %770 = vmatpush.bf16.msrb.mxu1 %v748_v32 }
  0xd0   : > { %v779_v36 = vpop.permute.xlu1 %778  ;;  %v777_v37 = vpop.permute.xlu0 %776 }
  0xd1   : > { %v783_v38 = vsel %vm363_vm4, %v779_v36, %v781_v25  ;;  %v782_v39 = vsel %vm363_vm4, %v777_v37, %v779_v36 }
  0xd2   : > { %v788_v17 = vsel %vm287_vm0, %v783_v38, 0  ;;  %v785_v40 = vsel %vm287_vm0, %v782_v39, 0 }
  0xd3   : > { %797 = vmatpush.bf16.msrb.mxu2 %v785_v40  ;;  %810 = vmatpush.bf16.msrb.mxu3 %v788_v17 }
  0xd6   : > { %1323 = vmatmul.msk.bf16.vlgmr.msra.gmra.mxu0 %vm283_vm1, %v1679_v16  ;;  %1324 = vmatmul.msk.bf16.vlgmr.msra.gmra.mxu1 %vm283_vm1, %v1679_v16 }
  0xd7   : > { %1329 = vmatmul.msk.bf16.vlgmr.msrb.gmra.mxu2 %vm283_vm1, %v1602_v54  ;;  %1330 = vmatmul.msk.bf16.vlgmr.msrb.gmra.mxu3 %vm283_vm1, %v1602_v54  ;;  %v949_v54 = vpop.permute.xlu2 %948 }
  0xd8   : > { %v863_v42 = vpop.permute.xlu1 %862  ;;  %v861_v43 = vpop.permute.xlu0 %860 }
  0xd9   : > { %v867_v44 = vsel %vm459_vm6, %v863_v42, %v865_v35  ;;  %v866_v45 = vsel %vm459_vm6, %v861_v43, %v863_v42 }
  0xda   : > { %v872_v46 = vsel %vm287_vm0, %v867_v44, 0  ;;  %v869_v47 = vsel %vm287_vm0, %v866_v45, 0 }
  0xdb   : > { %881 = vmatpush.bf16.msra.mxu2 %v869_v47  ;;  %894 = vmatpush.bf16.msra.mxu3 %v872_v46 }
  0xdf   : > { %v907_v62 = vpop.permute.xlu2 %906 }
  0xe0   : > { %v821_v48 = vpop.permute.xlu1 %820  ;;  %v819_v49 = vpop.permute.xlu0 %818 }
  0xe1   : > { %v825_v50 = vsel %vm411_vm2, %v821_v48, %v823_v41  ;;  %v824_v51 = vsel %vm411_vm2, %v819_v49, %v821_v48 }
  0xe2   : > { %v830_v52 = vsel %vm287_vm0, %v825_v50, 0  ;;  %v827_v53 = vsel %vm287_vm0, %v824_v51, 0 }
  0xe3   : > { %839 = vmatpush.bf16.msra.mxu0 %v827_v53  ;;  %852 = vmatpush.bf16.msra.mxu1 %v830_v52 }
  0xe6   : > { %1327 = vmatmul.msk.bf16.vlgmr.msrb.gmra.mxu0 %vm283_vm1, %v1534_v21  ;;  %1328 = vmatmul.msk.bf16.vlgmr.msrb.gmra.mxu1 %vm283_vm1, %v1534_v21  ;;  %v351_v21 = vpop.f32.mrf.mxu3 }
  0xe7   : > { %1333 = vmatmul.msk.bf16.vlgmr.msra.gmra.mxu2 %vm283_vm1, %v1628_v6  ;;  %1334 = vmatmul.msk.bf16.vlgmr.msra.gmra.mxu3 %vm283_vm1, %v1628_v6  ;;  %v1033_v8 = vpop.permute.xlu2 %1032 }
  0xe8   : > { %v947_v56 = vpop.permute.xlu1 %946  ;;  %v945_v57 = vpop.permute.xlu0 %944 }
  0xe9   : > { %v951_v58 = vsel %vm555_vm8, %v947_v56, %v949_v54  ;;  %v950_v59 = vsel %vm555_vm8, %v945_v57, %v947_v56 }
  0xea   : > { %v956_v60 = vsel %vm287_vm0, %v951_v58, 0  ;;  %v953_v61 = vsel %vm287_vm0, %v950_v59, 0 }
  0xeb   : > { %965 = vmatpush.bf16.msrb.mxu2 %v953_v61  ;;  %978 = vmatpush.bf16.msrb.mxu3 %v956_v60 }
  0xee   : > { %v353_v6 = vpop.f32.mrf.mxu3 }
  0xf0   : > { %v905_v0 = vpop.permute.xlu1 %904  ;;  %v903_v1 = vpop.permute.xlu0 %902 }
  0xf1   : > { %v909_v2 = vsel %vm507_vm5, %v905_v0, %v907_v62  ;;  %v908_v3 = vsel %vm507_vm5, %v903_v1, %v905_v0 }
  0xf2   : > { %v914_v4 = vsel %vm287_vm0, %v909_v2, 0  ;;  %v911_v5 = vsel %vm287_vm0, %v908_v3, 0 }
  0xf3   : > { %923 = vmatpush.bf16.msrb.mxu0 %v911_v5  ;;  %936 = vmatpush.bf16.msrb.mxu1 %v914_v4 }
  0xf6   : > { %1331 = vmatmul.msk.bf16.vlgmr.msra.gmra.mxu0 %vm283_vm1, %v1555_v26  ;;  %1332 = vmatmul.msk.bf16.vlgmr.msra.gmra.mxu1 %vm283_vm1, %v1555_v26  ;;  %v991_v26 = vpop.permute.xlu2 %990 }
  0xf7   : > { %1337 = vmatmul.msk.bf16.vlgmr.msrb.gmra.mxu2 %vm283_vm1, %v1654_v24  ;;  %1338 = vmatmul.msk.bf16.vlgmr.msrb.gmra.mxu3 %vm283_vm1, %v1654_v24 }
  0xf8   : > { %v1031_v10 = vpop.permute.xlu1 %1030  ;;  %v1029_v11 = vpop.permute.xlu0 %1028 }
  0xf9   : > { %v1035_v12 = vsel %vm651_vm9, %v1031_v10, %v1033_v8  ;;  %v1034_v13 = vsel %vm651_vm9, %v1029_v11, %v1031_v10 }
  0xfa   : > { %v1040_v14 = vsel %vm287_vm0, %v1035_v12, 0  ;;  %v1037_v15 = vsel %vm287_vm0, %v1034_v13, 0 }
  0xfb   : > { %1049 = vmatpush.bf16.msra.mxu2 %v1037_v15  ;;  %1062 = vmatpush.bf16.msra.mxu3 %v1040_v14 }
 0x100   : > { %v989_v18 = vpop.permute.xlu1 %988  ;;  %v987_v19 = vpop.permute.xlu0 %986 }
 0x101   : > { %v993_v20 = vsel %vm603_vm7, %v989_v18, %v991_v26  ;;  %v992_v22 = vsel %vm603_vm7, %v987_v19, %v989_v18 }
 0x102   : > { %v998_v23 = vsel %vm287_vm0, %v993_v20, 0  ;;  %v995_v24 = vsel %vm287_vm0, %v992_v22, 0  ;;  %v445_v25 = vpop.f32.mrf.mxu3 }
 0x103   : > { %1007 = vmatpush.bf16.msra.mxu0 %v995_v24  ;;  %1020 = vmatpush.bf16.msra.mxu1 %v998_v23 }
 0x106   : > { %1335 = vmatmul.msk.bf16.vlgmr.msrb.gmra.mxu0 %vm283_vm1, %v1607_v55  ;;  %1336 = vmatmul.msk.bf16.vlgmr.msrb.gmra.mxu1 %vm283_vm1, %v1607_v55 }
 0x107   : > { %1341 = vmatmul.msk.bf16.vlgmr.msra.gmra.mxu2 %vm283_vm1, %v1679_v16  ;;  %1342 = vmatmul.msk.bf16.vlgmr.msra.gmra.mxu3 %vm283_vm1, %v1679_v16 }
 0x10a   : > { %v447_v27 = vpop.f32.mrf.mxu3 }
 0x113   : > { %v303_v28 = vpop.f32.mrf.mxu0  ;;  %v316_v29 = vpop.f32.mrf.mxu1 }
 0x114   : > { %v339_v30 = vadd.f32 %v338_v63, %v303_v28  ;;  %v352_v31 = vadd.f32 %v351_v21, %v316_v29 }
 0x116   : > { %1339 = vmatmul.msk.bf16.vlgmr.msra.gmra.mxu0 %vm283_vm1, %v1633_v7  ;;  %1340 = vmatmul.msk.bf16.vlgmr.msra.gmra.mxu1 %vm283_vm1, %v1633_v7 }
 0x11a   : > { %v432_v32 = vpop.f32.mrf.mxu2 }
 0x11b   : > { %v305_v33 = vpop.f32.mrf.mxu0  ;;  %v318_v55 = vpop.f32.mrf.mxu1 }
 0x122   : > { %v434_v34 = vpop.f32.mrf.mxu2 }
 0x123   : > { %v384_v35 = vpop.f32.mrf.mxu0  ;;  %v397_v36 = vpop.f32.mrf.mxu1 }
 0x124   : > { %v401_v37 = vadd.f32 %v384_v35, %v339_v30  ;;  %v402_v38 = vadd.f32 %v397_v36, %v352_v31 }
 0x126   : > { %v449_v39 = vadd.f32 %v432_v32, %v401_v37  ;;  %v450_v17 = vadd.f32 %v445_v25, %v402_v38 }
 0x12a   : > { %v528_v40 = vpop.f32.mrf.mxu2  ;;  %v541_v16 = vpop.f32.mrf.mxu3 }
 0x12b   : > { %v386_v41 = vpop.f32.mrf.mxu0  ;;  %v399_v42 = vpop.f32.mrf.mxu1 }
 0x132   : > { %v530_v43 = vpop.f32.mrf.mxu2  ;;  %v543_v44 = vpop.f32.mrf.mxu3 }
 0x133   : > { %v480_v45 = vpop.f32.mrf.mxu0  ;;  %v493_v46 = vpop.f32.mrf.mxu1 }
 0x134   : > { %v497_v47 = vadd.f32 %v480_v45, %v449_v39  ;;  %v498_v7 = vadd.f32 %v493_v46, %v450_v17 }
 0x136   : > { %v545_v48 = vadd.f32 %v528_v40, %v497_v47  ;;  %v546_v49 = vadd.f32 %v541_v16, %v498_v7 }
 0x13a   : > { %v624_v50 = vpop.f32.mrf.mxu2  ;;  %v637_v51 = vpop.f32.mrf.mxu3 }
 0x13b   : > { %v482_v52 = vpop.f32.mrf.mxu0  ;;  %v495_v53 = vpop.f32.mrf.mxu1 }
 0x142   : > { %v626_v54 = vpop.f32.mrf.mxu2  ;;  %v639_v56 = vpop.f32.mrf.mxu3 }
 0x143   : > { %v576_v57 = vpop.f32.mrf.mxu0  ;;  %v589_v58 = vpop.f32.mrf.mxu1  ;;  %v1084_v54 = vld [vmem:[%s1780_s2] sm:$0x3] }
 0x144   : > { %v593_v59 = vadd.f32 %v576_v57, %v545_v48  ;;  %v594_v60 = vadd.f32 %v589_v58, %v546_v49  ;;  %v1090_v58 = vperm.slane %v1084_v54, 0 }
 0x146   : > { %v641_v61 = vadd.f32 %v624_v50, %v593_v59  ;;  %v642_v62 = vadd.f32 %v637_v51, %v594_v60  ;;  %v1091_v59 = vperm.slane %v1084_v54, 1 }
 0x14a   : > { %v727_v21 = vpop.f32.mrf.mxu2  ;;  %v740_v63 = vpop.f32.mrf.mxu3 }
 0x14b   : > { %v578_v0 = vpop.f32.mrf.mxu0  ;;  %v591_v1 = vpop.f32.mrf.mxu1 }
 0x152   : > { %v729_v2 = vpop.f32.mrf.mxu2  ;;  %v742_v3 = vpop.f32.mrf.mxu3 }
 0x153   : > { %v672_v4 = vpop.f32.mrf.mxu0  ;;  %v685_v5 = vpop.f32.mrf.mxu1 }
 0x154   : > { %v689_v6 = vadd.f32 %v672_v4, %v641_v61  ;;  %v690_v8 = vadd.f32 %v685_v5, %v642_v62  ;;  %v1420_v4 = vmov 0  }
 0x155   : > { %1383 = vset.pattern.permute.xlu1 %v1420_v4  ;;  %1384 = vset.pattern.permute.xlu0 %v1420_v4 }
 0x15a   : > { %v799_v9 = vpop.f32.mrf.mxu2  ;;  %v812_v10 = vpop.f32.mrf.mxu3 }
 0x15b   : > { %v674_v11 = vpop.f32.mrf.mxu0  ;;  %v687_v12 = vpop.f32.mrf.mxu1 }
 0x162   : > { %v801_v13 = vpop.f32.mrf.mxu2  ;;  %v814_v14 = vpop.f32.mrf.mxu3 }
 0x163   : > { %v759_v15 = vpop.f32.mrf.mxu0  ;;  %v772_v26 = vpop.f32.mrf.mxu1  ;;  %v1421_v13 = vmov 0.0  }
 0x164   : > { %v760_v32 = vadd.f32 %v759_v15, %v727_v21  ;;  %v773_v33 = vadd.f32 %v772_v26, %v740_v63  ;;  %1110 = vst.msk [vmem:[#allocation2] sm:$0xff] %vm1108_vm11, %v1421_v13 }
 0x165   : > { %1111 = vst.msk [vmem:[#allocation3] sm:$0xff] %vm1108_vm11, %v1421_v13 }
 0x166   : > { %v816_v37 = vadd.f32 %v799_v9, %v760_v32  ;;  %v817_v38 = vadd.f32 %v812_v10, %v773_v33 }
 0x16a   : > { %v883_v18 = vpop.f32.mrf.mxu2  ;;  %v896_v19 = vpop.f32.mrf.mxu3 }
 0x16b   : > { %v761_v20 = vpop.f32.mrf.mxu0  ;;  %v774_v22 = vpop.f32.mrf.mxu1 }
 0x172   : > { %v885_v23 = vpop.f32.mrf.mxu2  ;;  %v898_v24 = vpop.f32.mrf.mxu3 }
 0x173   : > { %v841_v25 = vpop.f32.mrf.mxu0  ;;  %v854_v27 = vpop.f32.mrf.mxu1 }
 0x174   : > { %v858_v39 = vadd.f32 %v841_v25, %v816_v37  ;;  %v859_v17 = vadd.f32 %v854_v27, %v817_v38  ;;  %v1127_v25 = vld [vmem:[#allocation2] sm:$0xff] }
 0x176   : > { %v900_v43 = vadd.f32 %v883_v18, %v858_v39  ;;  %v901_v44 = vadd.f32 %v896_v19, %v859_v17 }
 0x17a   : > { %v967_v28 = vpop.f32.mrf.mxu2  ;;  %v980_v29 = vpop.f32.mrf.mxu3 }
 0x17b   : > { %v843_v30 = vpop.f32.mrf.mxu0  ;;  %v856_v31 = vpop.f32.mrf.mxu1 }
 0x182   : > { %v969_v55 = vpop.f32.mrf.mxu2  ;;  %v982_v34 = vpop.f32.mrf.mxu3 }
 0x183   : > { %v925_v35 = vpop.f32.mrf.mxu0  ;;  %v938_v36 = vpop.f32.mrf.mxu1 }
 0x184   : > { %v942_v45 = vadd.f32 %v925_v35, %v900_v43  ;;  %v943_v46 = vadd.f32 %v938_v36, %v901_v44 }
 0x186   : > { %v984_v47 = vadd.f32 %v967_v28, %v942_v45  ;;  %v985_v7 = vadd.f32 %v980_v29, %v943_v46  ;;  %v1134_v28 = vld [vmem:[#allocation3] sm:$0xff]  ;;  %v1162_v46 = vld [vmem:[%s1781_s3] sm:$0xf] }
 0x18a   : > { %v1051_v40 = vpop.f32.mrf.mxu2  ;;  %v1064_v16 = vpop.f32.mrf.mxu3 }
 0x18b   : > { %v927_v41 = vpop.f32.mrf.mxu0  ;;  %v940_v42 = vpop.f32.mrf.mxu1 }
 0x192   : > { %v1053_v48 = vpop.f32.mrf.mxu2  ;;  %v1066_v49 = vpop.f32.mrf.mxu3 }
 0x193   : > { %v1009_v50 = vpop.f32.mrf.mxu0  ;;  %v1022_v51 = vpop.f32.mrf.mxu1 }
 0x194   : > { %v1026_v52 = vadd.f32 %v1009_v50, %v984_v47  ;;  %v1027_v53 = vadd.f32 %v1022_v51, %v985_v7  ;;  %v1180_v50 = vld [vmem:[%s1782_s4] sm:$0xf] }
 0x196   : > { %v1068_v56 = vadd.f32 %v1051_v40, %v1026_v52  ;;  %v1069_v57 = vadd.f32 %v1064_v16, %v1027_v53 }
 0x198   : > { %v1072_v60 = vrot.slane %v1068_v56, 4  ;;  %v1073_v61 = vrot.slane %v1069_v57, 4 }
 0x19a   : > { %v1077_v62 = vsel %vm1076_vm10, %v689_v6, %v1072_v60  ;;  %v1078_v21 = vsel %vm1076_vm10, %v690_v8, %v1073_v61 }
 0x19b   : > { %v1011_v63 = vpop.f32.mrf.mxu0  ;;  %v1024_v0 = vpop.f32.mrf.mxu1  ;;  %1083 = vst [vmem:[#allocation7 + $0x8] sm:$0xff] %v1078_v21  ;;  %v1094_v1 = vmul.f32 %v1090_v58, %v1077_v62  ;;  %v1095_v2 = vmul.f32 %v1091_v59, %v1078_v21 }
 0x19c   : > { %1082 = vst [vmem:[#allocation7] sm:$0xff] %v1077_v62 }
 0x19d   : > { %v1096_v3 = vadd.f32 %v1095_v2, %v1094_v1 }
 0x19f   : > { %1097 = vadd.xlane.f32.xlu0 %v1096_v3 }
 0x212   : > { %v1098_v5 = vpop.xlane.xlu0 %1097 }
 0x213   : > { %v1100_v9 = vrot.slane %v1098_v5, 4 }
 0x215   : > { %v1102_v10 = vadd.f32 %v1100_v9, %v1098_v5 }
 0x217   : > { %v1103_v11 = vmul.f32 0.0025510204, %v1102_v10 }
 0x219   : > { %v1105_v12 = vrot.slane %v1103_v11, 4 }
 0x21b   : > { %v1107_v6 = vsel %vm1076_vm10, %v1103_v11, %v1105_v12 }
 0x21c   : > { %1109 = vst.msk [vmem:[#allocation4] sm:$0xff] %vm1108_vm11, %v1107_v6 }
 0x223   : > { %v1160_v8 = vld [vmem:[#allocation4] sm:$0xff] }
 0x224   : > { %1115 = vperm.xlu1 %1383, %v1160_v8  }
 0x296   : > { %v1116_v14 = vpop.permute.xlu1 %1115 }
 0x297   : > { %v1118_v15 = vsub.f32 %v1077_v62, %v1116_v14  ;;  %v1119_v26 = vsub.f32 %v1078_v21, %v1116_v14 }
 0x299   : > { %v1125_v18 = vmul.f32 %v1118_v15, %v1090_v58  ;;  %v1126_v19 = vmul.f32 %v1119_v26, %v1091_v59 }
 0x29b   : > { %v1128_v20 = vadd.f32 %v1126_v19, %v1125_v18  ;;  %v1135_v22 = vmul.f32 %v1125_v18, %v1125_v18  ;;  %v1136_v23 = vmul.f32 %v1126_v19, %v1126_v19 }
 0x29d   : > { %1129 = vadd.xlane.f32.xlu2 %v1128_v20  ;;  %v1137_v24 = vadd.f32 %v1136_v23, %v1135_v22 }
 0x29f   : > { %1138 = vadd.xlane.f32.xlu1 %v1137_v24 }
 0x310   : > { %v1130_v27 = vpop.xlane.xlu2 %1129 }
 0x311   : > { %v1131_v29 = vadd.f32 %v1130_v27, %v1127_v25 }
 0x312   : > { %v1139_v30 = vpop.xlane.xlu1 %1138 }
 0x313   : > { %1133 = vst.msk [vmem:[#allocation2] sm:$0xff] %vm1108_vm11, %v1131_v29  ;;  %v1140_v31 = vadd.f32 %v1139_v30, %v1134_v28 }
 0x315   : > { %1141 = vst.msk [vmem:[#allocation3] sm:$0xff] %vm1108_vm11, %v1140_v31 }
 0x31a   : > { %v1145_v32 = vld [vmem:[#allocation2] sm:$0xff] }
 0x31b   : > { %v1147_v33 = vrot.slane %v1145_v32, 4 }
 0x31c   : > { %v1151_v55 = vld [vmem:[#allocation3] sm:$0xff] }
 0x31d   : > { %v1149_v34 = vadd.f32 %v1147_v33, %v1145_v32  ;;  %v1153_v35 = vrot.slane %v1151_v55, 4 }
 0x31f   : > { %v1150_v36 = vmul.f32 0.0025510204, %v1149_v34  ;;  %v1155_v37 = vadd.f32 %v1153_v35, %v1151_v55 }
 0x321   : > { %v1157_v38 = vmul.f32 %v1150_v36, %v1150_v36  ;;  %v1156_v39 = vmul.f32 0.0025510204, %v1155_v37  ;;  %v1161_v48 = vadd.f32 %v1160_v8, %v1150_v36 }
 0x323   : > { %v1158_v17 = vsub.f32 %v1156_v39, %v1157_v38 }
 0x325   : > { %v1159_v40 = vmax.f32 %v1158_v17, 0.0 }
 0x327   : > { %v1163_v16 = vadd.f32 1e-05, %v1159_v40 }
 0x329   : > { %1385 = vrsqrt.f32 %v1163_v16  ;;  %vm1170_vm13 = vweird.f32 %v1163_v16 }
 0x32f   : > { %v1386_v41 = vpop.eup %1385 }
 0x330   : > { %v1165_v42 = vmul.f32 %v1386_v41, %v1163_v16  ;;  %vm1171_vm12 = vweird.f32 %v1386_v41 }
 0x331   : > { %vm1172_vm14 = vmor %vm1170_vm13, %vm1171_vm12 }
 0x332   : > { %v1166_v43 = vmul.f32 %v1386_v41, %v1165_v42 }
 0x334   : > { %v1167_v44 = vmul.f32 0.5, %v1166_v43 }
 0x336   : > { %v1168_v45 = vsub.f32 1.5, %v1167_v44 }
 0x338   : > { %v1169_v47 = vmul.f32 %v1386_v41, %v1168_v45 }
 0x33a   : > { %v1173_v7 = vsel %vm1172_vm14, %v1386_v41, %v1169_v47 }
 0x33b   : > { %v1174_v49 = vmul.f32 %v1173_v7, %v1162_v46 }
 0x33d   : > { %v1176_v51 = vrot.slane %v1174_v49, 4  ;;  %v1181_v52 = vmul.f32 %v1174_v49, %v1161_v48 }
 0x33f   : > { %v1178_v53 = vsel %vm1076_vm10, %v1174_v49, %v1176_v51  ;;  %v1182_v54 = vsub.f32 %v1180_v50, %v1181_v52 }
 0x340   : > { %1179 = vst.msk [vmem:[#allocation5] sm:$0xff] %vm1108_vm11, %v1178_v53 }
 0x341   : > { %v1184_v56 = vrot.slane %v1182_v54, 4 }
 0x343   : > { %v1186_v57 = vsel %vm1076_vm10, %v1182_v54, %v1184_v56 }
 0x344   : > { %1187 = vst.msk [vmem:[#allocation6] sm:$0xff] %vm1108_vm11, %v1186_v57 }
 0x345 PF: > { %p1343_p5 = scmp.ne.s32.totalorder %s1402_s18, 1 }
 0x347   : > { %1191 = sbr.rel (%p1343_p5) target bundleno = 976 (0x3d0), region = 56 }
 0x34c   : > { %v1197_v58 = vld [vmem:[#allocation5] sm:$0xff]  ;;  %v1422_v59 = vmov 0   ;;  %v1205_v60 = vld [vmem:[#allocation6] sm:$0xff]  ;;  %v1195_v62 = vld [vmem:[#allocation7] sm:$0xff] }
 0x34d   : > { %1387 = vset.pattern.permute.xlu0 %v1422_v59  ;;  %v1196_v21 = vld [vmem:[#allocation7 + $0x8] sm:$0xff] }
 0x34e   : > { %1200 = vperm.xlu0 %1387, %v1197_v58  }
 0x356   : > { %1208 = vperm.xlu0 %1387, %v1205_v60  }
 0x3c0   : > { %v1201_v61 = vpop.permute.xlu0 %1200 }
 0x3c1   : > { %v1203_v63 = vmul.f32 %v1201_v61, %v1195_v62  ;;  %v1204_v0 = vmul.f32 %v1201_v61, %v1196_v21 }
 0x3c8   : > { %v1209_v1 = vpop.permute.xlu0 %1208 }
 0x3c9   : > { %v1211_v2 = vadd.f32 %v1209_v1, %v1203_v63  ;;  %v1212_v3 = vadd.f32 %v1209_v1, %v1204_v0 }
 0x3cb   : > { %vm1213_vm15 = vcmp.gt.f32.partialorder %v1211_v2, 0.0  ;;  %vm1214_vm0 = vcmp.gt.f32.partialorder %v1212_v3, 0.0  ;;  %v1215_v4 = vmul.f32 0.01, %v1211_v2  ;;  %v1216_v5 = vmul.f32 0.01, %v1212_v3 }
 0x3cd   : > { %v1217_v9 = vsel %vm1213_vm15, %v1211_v2, %v1215_v4  ;;  %v1218_v10 = vsel %vm1214_vm0, %v1212_v3, %v1216_v5 }
 0x3ce   : > { %1219 = vst [vmem:[%s1783_s5] sm:$0xff] %v1217_v9 }
 0x3cf   : > { %1220 = vst [vmem:[%s1783_s5 + $0x8] sm:$0xff] %v1218_v10 }
 0x3d0 PF: > { %s15_s20 = sadd.s32 1, %s1410_s20   ;;  %s1784_s18 = smov %s1406_s19 }
 0x3d1   : > { %p12_p6 = scmp.ge.s32.totalorder %s15_s20, 4   ;;  %s1785_s19 = smov %s1787_s21 }
 0x3d3   :  { %14 = sbr.rel (!%p12_p6) target bundleno = 2 (0x2), region = 96 }

</bundles_post_ra>
